<compile_context>
chip_gen: v5e
topology: v5e:2x2
jax: 0.10.0
libtpu: 0.0.40
codegen_flags: <defaults>
</compile_context>

<pallas_src>
import functools
import math

import jax
import jax.numpy as jnp
from jax.experimental import pallas as pl
from jax.experimental.pallas import tpu as pltpu


COMPUTE_DTYPE = jnp.bfloat16   # MXU input dtype (f32 accumulation everywhere)


def _round_up(x, m):
    return ((x + m - 1) // m) * m


def _tile(dim, max_tile, align):
    """Pick (tile, padded_dim) so padded_dim % tile == 0 and tile respects `align`."""
    if dim >= max_tile:
        t = max_tile
    else:
        t = _round_up(dim, align)
    return t, _round_up(dim, t)


# --------------------------------------------------------------------------
# Generic tiled linear kernel: y = x @ w + b   (used for the final classifier)
# --------------------------------------------------------------------------

def _linear_kernel(x_ref, w_ref, b_ref, o_ref, acc_ref):
    @pl.when(pl.program_id(2) == 0)
    def _():
        acc_ref[...] = jnp.zeros_like(acc_ref)

    acc_ref[...] += jnp.dot(x_ref[...], w_ref[...],
                            preferred_element_type=jnp.float32)

    @pl.when(pl.program_id(2) == pl.num_programs(2) - 1)
    def _():
        o_ref[...] = (acc_ref[...] + b_ref[...]).astype(o_ref.dtype)


def linear(x, w, b):
    """x: (..., K) @ w: (K, N) + b: (N,) -> (..., N)."""
    orig_shape = x.shape
    K = orig_shape[-1]
    N = w.shape[1]
    x2 = x.reshape(-1, K)
    M = x2.shape[0]

    tm, Mp = _tile(M, 128, 8)
    tn, Np = _tile(N, 128, 128)    # lane-dense output tiles (>=128)
    tk, Kp = _tile(K, 512, 8)

    if (Mp, Kp) != (M, K):
        x2 = jnp.pad(x2, ((0, Mp - M), (0, Kp - K)))
    wp = w if (Kp, Np) == (K, N) else jnp.pad(w, ((0, Kp - K), (0, Np - N)))
    bp = b if Np == N else jnp.pad(b, (0, Np - N))

    x2 = x2.astype(COMPUTE_DTYPE)
    wp = wp.astype(COMPUTE_DTYPE)
    bp = bp.reshape(1, Np).astype(jnp.float32)

    out = pl.pallas_call(
        _linear_kernel,
        out_shape=jax.ShapeDtypeStruct((Mp, Np), jnp.float32),
        grid=(Mp // tm, Np // tn, Kp // tk),
        in_specs=[
            pl.BlockSpec((tm, tk), lambda i, j, k: (i, k)),
            pl.BlockSpec((tk, tn), lambda i, j, k: (k, j)),
            pl.BlockSpec((1, tn), lambda i, j, k: (0, j)),
        ],
        out_specs=pl.BlockSpec((tm, tn), lambda i, j, k: (i, j)),
        scratch_shapes=[pltpu.VMEM((tm, tn), jnp.float32)],
        compiler_params=pltpu.CompilerParams(
            dimension_semantics=("parallel", "parallel", "arbitrary")),
    )(x2, wp, bp)

    out = out[:M, :N]
    return out.reshape(*orig_shape[:-1], N)


# --------------------------------------------------------------------------
# Fused attention block: QKV proj -> masked softmax attention -> output proj
#                        -> residual add -> LayerNorm       (one program per batch)
# --------------------------------------------------------------------------

def _attn_block_kernel(xq_ref, xkv_ref, m_ref, wq_ref, wk_ref, wv_ref,
                       bq_ref, bk_ref, bv_ref, wo_ref, bo_ref, g_ref, beta_ref,
                       o_ref, *, scale, eps):
    H = wq_ref.shape[0]
    xq = xq_ref[0]                                     # (Sq, D) f32 (kept for residual)
    xkv = xkv_ref[0]                                   # (Sk, D) f32
    Sq, D = xq.shape
    Sk = xkv.shape[0]

    xq_b = jnp.broadcast_to(xq.astype(COMPUTE_DTYPE)[None], (H, Sq, D))
    xkv_b = jnp.broadcast_to(xkv.astype(COMPUTE_DTYPE)[None], (H, Sk, D))

    dn_proj = (((2,), (1,)), ((0,), (0,)))             # contract D, batch over H
    q = jax.lax.dot_general(xq_b, wq_ref[...], dn_proj,
                            preferred_element_type=jnp.float32) + bq_ref[...]
    k = jax.lax.dot_general(xkv_b, wk_ref[...], dn_proj,
                            preferred_element_type=jnp.float32) + bk_ref[...]
    v = jax.lax.dot_general(xkv_b, wv_ref[...], dn_proj,
                            preferred_element_type=jnp.float32) + bv_ref[...]

    # scores[h, i, j] = sum_d q[h,i,d] * k[h,j,d]   (no explicit K transpose)
    scores = jax.lax.dot_general(
        q.astype(COMPUTE_DTYPE), k.astype(COMPUTE_DTYPE),
        (((2,), (2,)), ((0,), (0,))),
        preferred_element_type=jnp.float32) * scale    # (H, Sq, Sk) f32

    mask = m_ref[0]                                    # (Sq_m, Sk) int32
    scores = jnp.where(mask[None] == 0, jnp.float32(-1e9), scores)
    scores = scores - jnp.max(scores, axis=-1, keepdims=True)
    e = jnp.exp(scores)
    denom = jnp.sum(e, axis=-1, keepdims=True)
    p = e * pl.reciprocal(denom, approx=True)

    ctx = jax.lax.dot_general(
        p.astype(COMPUTE_DTYPE), v.astype(COMPUTE_DTYPE),
        (((2,), (1,)), ((0,), (0,))),
        preferred_element_type=jnp.float32)            # (H, Sq, Dh)

    # output projection: (H, Sq, Dh) x (H, Dh, D) -> sum over heads -> (Sq, D)
    proj = jax.lax.dot_general(
        ctx.astype(COMPUTE_DTYPE), wo_ref[...],
        (((2,), (1,)), ((0,), (0,))),
        preferred_element_type=jnp.float32)            # (H, Sq, D)
    proj = jnp.sum(proj, axis=0) + bo_ref[...]         # (Sq, D)

    # residual add + LayerNorm (biased variance, like torch)
    y = proj + xq
    mean = jnp.mean(y, axis=-1, keepdims=True)
    var = jnp.mean((y - mean) ** 2, axis=-1, keepdims=True)
    y = (y - mean) * jax.lax.rsqrt(var + eps)
    o_ref[0] = (y * g_ref[...] + beta_ref[...]).astype(o_ref.dtype)


def attention_block(x_q, x_kv, mask, p, n_heads, gamma, beta, eps=1e-5):
    """LayerNorm(x_q + MultiHeadAttention(x_q, x_kv, x_kv, mask))."""
    B, Sq, D = x_q.shape
    Sk = x_kv.shape[1]
    d_k = D // n_heads

    def heads_w(w):     # (D, D) -> (H, D, Dh)
        return w.reshape(D, n_heads, d_k).transpose(1, 0, 2).astype(COMPUTE_DTYPE)

    def heads_b(b):     # (D,) -> (H, 1, Dh)
        return b.reshape(n_heads, 1, d_k).astype(jnp.float32)

    wq_h, wk_h, wv_h = heads_w(p["wq"]), heads_w(p["wk"]), heads_w(p["wv"])
    bq_h, bk_h, bv_h = heads_b(p["bq"]), heads_b(p["bk"]), heads_b(p["bv"])
    wo_h = p["wo"].reshape(n_heads, d_k, D).astype(COMPUTE_DTYPE)
    bo = p["bo"].reshape(1, D).astype(jnp.float32)

    mask = mask.astype(jnp.int32)                      # (B, 1, Sk) or (B, Sq, Sk)
    Sq_m = mask.shape[1]

    const3 = lambda b: (0, 0, 0)
    const2 = lambda b: (0, 0)

    return pl.pallas_call(
        functools.partial(_attn_block_kernel,
                          scale=1.0 / math.sqrt(d_k), eps=eps),
        out_shape=jax.ShapeDtypeStruct((B, Sq, D), jnp.float32),
        grid=(B,),
        in_specs=[
            pl.BlockSpec((1, Sq, D), lambda b: (b, 0, 0)),
            pl.BlockSpec((1, Sk, D), lambda b: (b, 0, 0)),
            pl.BlockSpec((1, Sq_m, Sk), lambda b: (b, 0, 0)),
            pl.BlockSpec((n_heads, D, d_k), const3),
            pl.BlockSpec((n_heads, D, d_k), const3),
            pl.BlockSpec((n_heads, D, d_k), const3),
            pl.BlockSpec((n_heads, 1, d_k), const3),
            pl.BlockSpec((n_heads, 1, d_k), const3),
            pl.BlockSpec((n_heads, 1, d_k), const3),
            pl.BlockSpec((n_heads, d_k, D), const3),
            pl.BlockSpec((1, D), const2),
            pl.BlockSpec((1, D), const2),
            pl.BlockSpec((1, D), const2),
        ],
        out_specs=pl.BlockSpec((1, Sq, D), lambda b: (b, 0, 0)),
        compiler_params=pltpu.CompilerParams(dimension_semantics=("parallel",)),
    )(x_q, x_kv, mask, wq_h, wk_h, wv_h, bq_h, bk_h, bv_h, wo_h, bo,
      gamma.reshape(1, D).astype(jnp.float32), beta.reshape(1, D).astype(jnp.float32))


# --------------------------------------------------------------------------
# Fused feed-forward block: Linear+ReLU -> Linear -> residual add -> LayerNorm
# --------------------------------------------------------------------------

def _ffn_block_kernel(x_ref, w1_ref, b1_ref, w2_ref, b2_ref, g_ref, beta_ref,
                      o_ref, *, eps):
    x = x_ref[...]                                     # (tm, D) f32
    h = jnp.dot(x.astype(COMPUTE_DTYPE), w1_ref[...],
                preferred_element_type=jnp.float32) + b1_ref[...]
    h = jnp.maximum(h, 0.0)
    y = jnp.dot(h.astype(COMPUTE_DTYPE), w2_ref[...],
                preferred_element_type=jnp.float32) + b2_ref[...]
    y = y + x
    mean = jnp.mean(y, axis=-1, keepdims=True)
    var = jnp.mean((y - mean) ** 2, axis=-1, keepdims=True)
    y = (y - mean) * jax.lax.rsqrt(var + eps)
    o_ref[...] = (y * g_ref[...] + beta_ref[...]).astype(o_ref.dtype)


def ffn_block(x, p, gamma, beta, eps=1e-5):
    """LayerNorm(x + W2 @ relu(W1 @ x + b1) + b2)."""
    shape = x.shape
    D = shape[-1]
    F = p["w1"].shape[1]
    x2 = x.reshape(-1, D)
    M = x2.shape[0]

    tm, Mp = _tile(M, 256, 8)
    if Mp != M:
        x2 = jnp.pad(x2, ((0, Mp - M), (0, 0)))

    # TODO(synk): d_ff is tiny here; for large d_ff the hidden dim would need its own
    # grid axis instead of being kept fully resident in VMEM.
    out = pl.pallas_call(
        functools.partial(_ffn_block_kernel, eps=eps),
        out_shape=jax.ShapeDtypeStruct((Mp, D), jnp.float32),
        grid=(Mp // tm,),
        in_specs=[
            pl.BlockSpec((tm, D), lambda i: (i, 0)),
            pl.BlockSpec((D, F), lambda i: (0, 0)),
            pl.BlockSpec((1, F), lambda i: (0, 0)),
            pl.BlockSpec((F, D), lambda i: (0, 0)),
            pl.BlockSpec((1, D), lambda i: (0, 0)),
            pl.BlockSpec((1, D), lambda i: (0, 0)),
            pl.BlockSpec((1, D), lambda i: (0, 0)),
        ],
        out_specs=pl.BlockSpec((tm, D), lambda i: (i, 0)),
        compiler_params=pltpu.CompilerParams(dimension_semantics=("parallel",)),
    )(x2,
      p["w1"].astype(COMPUTE_DTYPE), p["b1"].reshape(1, F).astype(jnp.float32),
      p["w2"].astype(COMPUTE_DTYPE), p["b2"].reshape(1, D).astype(jnp.float32),
      gamma.reshape(1, D).astype(jnp.float32), beta.reshape(1, D).astype(jnp.float32))
    return out[:M].reshape(shape)


# --------------------------------------------------------------------------
# Model assembly (glue in plain JAX)
# --------------------------------------------------------------------------

def encoder_layer(x, src_mask, p, n_heads):
    x = attention_block(x, x, src_mask, p["self_attn"], n_heads,
                        p["norm1_g"], p["norm1_b"])
    x = ffn_block(x, p["ff"], p["norm2_g"], p["norm2_b"])
    return x


def decoder_layer(x, enc_out, src_mask, tgt_mask, p, n_heads):
    x = attention_block(x, x, tgt_mask, p["self_attn"], n_heads,
                        p["norm1_g"], p["norm1_b"])
    x = attention_block(x, enc_out, src_mask, p["cross_attn"], n_heads,
                        p["norm2_g"], p["norm2_b"])
    x = ffn_block(x, p["ff"], p["norm3_g"], p["norm3_b"])
    return x


def positional_encoding(max_seq_length, d_model):
    pos = jnp.arange(max_seq_length, dtype=jnp.float32)[:, None]
    i = jnp.arange(0, d_model, 2, dtype=jnp.float32)[None, :]
    div = jnp.exp(i * (-math.log(10000.0) / d_model))
    pe = jnp.zeros((max_seq_length, d_model), dtype=jnp.float32)
    pe = pe.at[:, 0::2].set(jnp.sin(pos * div))
    pe = pe.at[:, 1::2].set(jnp.cos(pos * div))
    return pe


def generate_mask(src, tgt):
    # compact masks (no head broadcast): encoder/cross mask is key-padding only,
    # decoder self-attention mask is query-padding & causal (matches torch broadcast).
    src_mask = (src != 0)[:, None, :].astype(jnp.int32)                   # (B, 1, Ss)
    St = tgt.shape[1]
    causal = jnp.tril(jnp.ones((St, St), dtype=bool))
    tgt_mask = ((tgt != 0)[:, :, None] & causal[None]).astype(jnp.int32)  # (B, St, St)
    return src_mask, tgt_mask


def transformer_forward(params, src, tgt, n_heads, num_layers):
    src_mask, tgt_mask = generate_mask(src, tgt)
    pe = params["pe"]

    # TODO(synk): embedding lookup kept as a plain-JAX gather (jnp.take); a DMA-gather
    # Pallas kernel is unnecessary at these vocab/seq sizes.
    src_emb = jnp.take(params["enc_emb"], src, axis=0) + pe[None, : src.shape[1]]
    tgt_emb = jnp.take(params["dec_emb"], tgt, axis=0) + pe[None, : tgt.shape[1]]
    # dropout: identity (eval mode)

    enc_out = src_emb
    for l in range(num_layers):
        enc_out = encoder_layer(enc_out, src_mask, params["enc_layers"][l], n_heads)

    dec_out = tgt_emb
    for l in range(num_layers):
        dec_out = decoder_layer(dec_out, enc_out, src_mask, tgt_mask,
                                params["dec_layers"][l], n_heads)

    # final classifier: N (=tgt_vocab) is padded to a multiple of 128 inside linear()
    return linear(dec_out, params["fc_w"], params["fc_b"])


transformer_forward_jit = jax.jit(transformer_forward, static_argnums=(3, 4))


# --------------------------------------------------------------------------
# Deterministic parameter init
# --------------------------------------------------------------------------

def _init_linear(key, d_in, d_out):
    kw, kb = jax.random.split(key)
    w = jax.random.normal(kw, (d_in, d_out), jnp.float32) * 0.02
    b = jax.random.normal(kb, (d_out,), jnp.float32) * 0.02
    return w, b


def _init_mha(key, d_model):
    ks = jax.random.split(key, 4)
    wq, bq = _init_linear(ks[0], d_model, d_model)
    wk, bk = _init_linear(ks[1], d_model, d_model)
    wv, bv = _init_linear(ks[2], d_model, d_model)
    wo, bo = _init_linear(ks[3], d_model, d_model)
    return dict(wq=wq, bq=bq, wk=wk, bk=bk, wv=wv, bv=bv, wo=wo, bo=bo)


def _init_ff(key, d_model, d_ff):
    k1, k2 = jax.random.split(key)
    w1, b1 = _init_linear(k1, d_model, d_ff)
    w2, b2 = _init_linear(k2, d_ff, d_model)
    return dict(w1=w1, b1=b1, w2=w2, b2=b2)


def _init_enc_layer(key, d_model, d_ff):
    k1, k2 = jax.random.split(key)
    return dict(
        self_attn=_init_mha(k1, d_model),
        ff=_init_ff(k2, d_model, d_ff),
        norm1_g=jnp.ones((d_model,), jnp.float32), norm1_b=jnp.zeros((d_model,), jnp.float32),
        norm2_g=jnp.ones((d_model,), jnp.float32), norm2_b=jnp.zeros((d_model,), jnp.float32),
    )


def _init_dec_layer(key, d_model, d_ff):
    k1, k2, k3 = jax.random.split(key, 3)
    return dict(
        self_attn=_init_mha(k1, d_model),
        cross_attn=_init_mha(k2, d_model),
        ff=_init_ff(k3, d_model, d_ff),
        norm1_g=jnp.ones((d_model,), jnp.float32), norm1_b=jnp.zeros((d_model,), jnp.float32),
        norm2_g=jnp.ones((d_model,), jnp.float32), norm2_b=jnp.zeros((d_model,), jnp.float32),
        norm3_g=jnp.ones((d_model,), jnp.float32), norm3_b=jnp.zeros((d_model,), jnp.float32),
    )


def init_params(key, src_vocab, tgt_vocab, d_model, num_layers, d_ff, max_seq_length):
    keys = jax.random.split(key, 3 + 2 * num_layers)
    enc_emb = jax.random.normal(keys[0], (src_vocab, d_model), jnp.float32) * 0.02
    dec_emb = jax.random.normal(keys[1], (tgt_vocab, d_model), jnp.float32) * 0.02
    fc_w, fc_b = _init_linear(keys[2], d_model, tgt_vocab)
    enc_layers = [_init_enc_layer(keys[3 + i], d_model, d_ff) for i in range(num_layers)]
    dec_layers = [_init_dec_layer(keys[3 + num_layers + i], d_model, d_ff)
                  for i in range(num_layers)]
    return dict(enc_emb=enc_emb, dec_emb=dec_emb, fc_w=fc_w, fc_b=fc_b,
                enc_layers=enc_layers, dec_layers=dec_layers,
                pe=positional_encoding(max_seq_length, d_model))


# --------------------------------------------------------------------------
# Main
# --------------------------------------------------------------------------

if __name__ == "__main__":
    src_vocab_size = 19
    tgt_vocab_size = 17
    d_model = 32
    n_heads = 4
    num_layers = 2
    d_ff = 64
    max_seq_length = 16
    batch, seq = 2, 8

    key = jax.random.PRNGKey(0)
    kp, ks, kt = jax.random.split(key, 3)

    params = init_params(kp, src_vocab_size, tgt_vocab_size, d_model,
                         num_layers, d_ff, max_seq_length)

    src = jax.random.randint(ks, (batch, seq), 1, src_vocab_size, dtype=jnp.int32)
    tgt = jax.random.randint(kt, (batch, seq), 1, tgt_vocab_size, dtype=jnp.int32)
    # introduce padding (token 0) to exercise the masks
    src = src.at[:, -2:].set(0)
    tgt = tgt.at[:, -1:].set(0)

    out = transformer_forward_jit(params, src, tgt, n_heads, num_layers)
    out = jax.block_until_ready(out)
    assert out.shape == (batch, seq, tgt_vocab_size)
    assert bool(jnp.all(jnp.isfinite(out)))
    print("KERNEL_OK")
</pallas_src>

<mosaic_0001>
module attributes {stable_mosaic.version = 11 : i64} {
  func.func @_attn_block_kernel(%arg0: i32, %arg1: memref<1x8x32xf32, #tpu.memory_space<vmem>>, %arg2: memref<1x8x32xf32, #tpu.memory_space<vmem>>, %arg3: memref<1x1x8xi32, #tpu.memory_space<vmem>>, %arg4: memref<4x32x8xbf16, #tpu.memory_space<vmem>>, %arg5: memref<4x32x8xbf16, #tpu.memory_space<vmem>>, %arg6: memref<4x32x8xbf16, #tpu.memory_space<vmem>>, %arg7: memref<4x1x8xf32, #tpu.memory_space<vmem>>, %arg8: memref<4x1x8xf32, #tpu.memory_space<vmem>>, %arg9: memref<4x1x8xf32, #tpu.memory_space<vmem>>, %arg10: memref<4x8x32xbf16, #tpu.memory_space<vmem>>, %arg11: memref<1x32xf32, #tpu.memory_space<vmem>>, %arg12: memref<1x32xf32, #tpu.memory_space<vmem>>, %arg13: memref<1x32xf32, #tpu.memory_space<vmem>>, %arg14: memref<1x8x32xf32, #tpu.memory_space<vmem>>) attributes {dimension_semantics = [#tpu.dimension_semantics<parallel>], iteration_bounds = array<i64: 2>, scalar_prefetch = 0 : i64, scratch_operands = 0 : i64, tpu.core_type = #tpu.core_type<tc>, window_params = [{transform_indices = @transform_0, window_bounds = array<i64: 1, 8, 32>}, {transform_indices = @transform_1, window_bounds = array<i64: 1, 8, 32>}, {transform_indices = @transform_2, window_bounds = array<i64: 1, 1, 8>}, {pipeline_mode = #tpu.pipeline_mode<synchronous>, transform_indices = @transform_3, window_bounds = array<i64: 4, 32, 8>}, {pipeline_mode = #tpu.pipeline_mode<synchronous>, transform_indices = @transform_4, window_bounds = array<i64: 4, 32, 8>}, {pipeline_mode = #tpu.pipeline_mode<synchronous>, transform_indices = @transform_5, window_bounds = array<i64: 4, 32, 8>}, {pipeline_mode = #tpu.pipeline_mode<synchronous>, transform_indices = @transform_6, window_bounds = array<i64: 4, 1, 8>}, {pipeline_mode = #tpu.pipeline_mode<synchronous>, transform_indices = @transform_7, window_bounds = array<i64: 4, 1, 8>}, {pipeline_mode = #tpu.pipeline_mode<synchronous>, transform_indices = @transform_8, window_bounds = array<i64: 4, 1, 8>}, {pipeline_mode = #tpu.pipeline_mode<synchronous>, transform_indices = @transform_9, window_bounds = array<i64: 4, 8, 32>}, {pipeline_mode = #tpu.pipeline_mode<synchronous>, transform_indices = @transform_10, window_bounds = array<i64: 1, 32>}, {pipeline_mode = #tpu.pipeline_mode<synchronous>, transform_indices = @transform_11, window_bounds = array<i64: 1, 32>}, {pipeline_mode = #tpu.pipeline_mode<synchronous>, transform_indices = @transform_12, window_bounds = array<i64: 1, 32>}, {transform_indices = @transform_13, window_bounds = array<i64: 1, 8, 32>}]} {
    %c0 = arith.constant 0 : index
    %c0_0 = arith.constant 0 : index
    %c0_1 = arith.constant 0 : index
    %0 = vector.load %arg1[%c0, %c0_0, %c0_1] : memref<1x8x32xf32, #tpu.memory_space<vmem>>, vector<1x8x32xf32>
    %1 = vector.shape_cast %0 : vector<1x8x32xf32> to vector<8x32xf32>
    %c0_2 = arith.constant 0 : index
    %c0_3 = arith.constant 0 : index
    %c0_4 = arith.constant 0 : index
    %2 = vector.load %arg2[%c0_2, %c0_3, %c0_4] : memref<1x8x32xf32, #tpu.memory_space<vmem>>, vector<1x8x32xf32>
    %3 = vector.shape_cast %2 : vector<1x8x32xf32> to vector<8x32xf32>
    %4 = arith.truncf %1 : vector<8x32xf32> to vector<8x32xbf16>
    %5 = vector.shape_cast %4 : vector<8x32xbf16> to vector<1x8x32xbf16>
    %6 = vector.shape_cast %5 : vector<1x8x32xbf16> to vector<1x8x32xbf16>
    %7 = vector.broadcast %6 : vector<1x8x32xbf16> to vector<4x8x32xbf16>
    %8 = arith.truncf %3 : vector<8x32xf32> to vector<8x32xbf16>
    %9 = vector.shape_cast %8 : vector<8x32xbf16> to vector<1x8x32xbf16>
    %10 = vector.shape_cast %9 : vector<1x8x32xbf16> to vector<1x8x32xbf16>
    %11 = vector.broadcast %10 : vector<1x8x32xbf16> to vector<4x8x32xbf16>
    %c0_5 = arith.constant 0 : index
    %c0_6 = arith.constant 0 : index
    %c0_7 = arith.constant 0 : index
    %12 = vector.load %arg4[%c0_5, %c0_6, %c0_7] : memref<4x32x8xbf16, #tpu.memory_space<vmem>>, vector<4x32x8xbf16>
    %cst = arith.constant dense<0.000000e+00> : vector<4x8x8xf32>
    %13 = tpu.matmul %7, %12, %cst {dimension_numbers = #tpu.dot_dimension_numbers<[2], [1], [1], [2], [0, 0, 0, 1, 1, 2], [0], [0]>} : vector<4x8x32xbf16>, vector<4x32x8xbf16>, vector<4x8x8xf32> -> vector<4x8x8xf32>
    %c0_8 = arith.constant 0 : index
    %c0_9 = arith.constant 0 : index
    %c0_10 = arith.constant 0 : index
    %14 = vector.load %arg7[%c0_8, %c0_9, %c0_10] : memref<4x1x8xf32, #tpu.memory_space<vmem>>, vector<4x1x8xf32>
    %15 = vector.broadcast %14 : vector<4x1x8xf32> to vector<4x8x8xf32>
    %16 = arith.addf %13, %15 : vector<4x8x8xf32>
    %c0_11 = arith.constant 0 : index
    %c0_12 = arith.constant 0 : index
    %c0_13 = arith.constant 0 : index
    %17 = vector.load %arg5[%c0_11, %c0_12, %c0_13] : memref<4x32x8xbf16, #tpu.memory_space<vmem>>, vector<4x32x8xbf16>
    %cst_14 = arith.constant dense<0.000000e+00> : vector<4x8x8xf32>
    %18 = tpu.matmul %11, %17, %cst_14 {dimension_numbers = #tpu.dot_dimension_numbers<[2], [1], [1], [2], [0, 0, 0, 1, 1, 2], [0], [0]>} : vector<4x8x32xbf16>, vector<4x32x8xbf16>, vector<4x8x8xf32> -> vector<4x8x8xf32>
    %c0_15 = arith.constant 0 : index
    %c0_16 = arith.constant 0 : index
    %c0_17 = arith.constant 0 : index
    %19 = vector.load %arg8[%c0_15, %c0_16, %c0_17] : memref<4x1x8xf32, #tpu.memory_space<vmem>>, vector<4x1x8xf32>
    %20 = vector.broadcast %19 : vector<4x1x8xf32> to vector<4x8x8xf32>
    %21 = arith.addf %18, %20 : vector<4x8x8xf32>
    %c0_18 = arith.constant 0 : index
    %c0_19 = arith.constant 0 : index
    %c0_20 = arith.constant 0 : index
    %22 = vector.load %arg6[%c0_18, %c0_19, %c0_20] : memref<4x32x8xbf16, #tpu.memory_space<vmem>>, vector<4x32x8xbf16>
    %cst_21 = arith.constant dense<0.000000e+00> : vector<4x8x8xf32>
    %23 = tpu.matmul %11, %22, %cst_21 {dimension_numbers = #tpu.dot_dimension_numbers<[2], [1], [1], [2], [0, 0, 0, 1, 1, 2], [0], [0]>} : vector<4x8x32xbf16>, vector<4x32x8xbf16>, vector<4x8x8xf32> -> vector<4x8x8xf32>
    %c0_22 = arith.constant 0 : index
    %c0_23 = arith.constant 0 : index
    %c0_24 = arith.constant 0 : index
    %24 = vector.load %arg9[%c0_22, %c0_23, %c0_24] : memref<4x1x8xf32, #tpu.memory_space<vmem>>, vector<4x1x8xf32>
    %25 = vector.broadcast %24 : vector<4x1x8xf32> to vector<4x8x8xf32>
    %26 = arith.addf %23, %25 : vector<4x8x8xf32>
    %27 = arith.truncf %16 : vector<4x8x8xf32> to vector<4x8x8xbf16>
    %28 = arith.truncf %21 : vector<4x8x8xf32> to vector<4x8x8xbf16>
    %cst_25 = arith.constant dense<0.000000e+00> : vector<4x8x8xf32>
    %29 = tpu.matmul %27, %28, %cst_25 {dimension_numbers = #tpu.dot_dimension_numbers<[2], [2], [1], [1], [0, 0, 0, 1, 1, 1], [0], [0]>} : vector<4x8x8xbf16>, vector<4x8x8xbf16>, vector<4x8x8xf32> -> vector<4x8x8xf32>
    %cst_26 = arith.constant 0.353553385 : f32
    %30 = vector.broadcast %cst_26 : f32 to vector<4x8x8xf32>
    %31 = arith.mulf %29, %30 : vector<4x8x8xf32>
    %c0_27 = arith.constant 0 : index
    %c0_28 = arith.constant 0 : index
    %c0_29 = arith.constant 0 : index
    %32 = vector.load %arg3[%c0_27, %c0_28, %c0_29] : memref<1x1x8xi32, #tpu.memory_space<vmem>>, vector<1x1x8xi32>
    %33 = vector.shape_cast %32 : vector<1x1x8xi32> to vector<1x8xi32>
    %34 = vector.shape_cast %33 : vector<1x8xi32> to vector<1x1x8xi32>
    %c0_i32 = arith.constant 0 : i32
    %35 = vector.broadcast %c0_i32 : i32 to vector<1x1x8xi32>
    %36 = arith.cmpi eq, %34, %35 : vector<1x1x8xi32>
    %cst_30 = arith.constant -1.000000e+09 : f32
    %37 = vector.shape_cast %36 : vector<1x1x8xi1> to vector<1x1x8xi1>
    %38 = vector.broadcast %37 : vector<1x1x8xi1> to vector<4x8x8xi1>
    %39 = vector.broadcast %cst_30 : f32 to vector<4x8x8xf32>
    %40 = arith.select %38, %39, %31 : vector<4x8x8xi1>, vector<4x8x8xf32>
    %cst_31 = arith.constant dense<0xFF800000> : vector<4x8xf32>
    %41 = vector.multi_reduction <maximumf>, %40, %cst_31 [2] : vector<4x8x8xf32> to vector<4x8xf32>
    %42 = vector.shape_cast %41 : vector<4x8xf32> to vector<4x8x1xf32>
    %43 = vector.broadcast %42 : vector<4x8x1xf32> to vector<4x8x8xf32>
    %44 = arith.subf %40, %43 : vector<4x8x8xf32>
    %45 = math.exp %44 : vector<4x8x8xf32>
    %cst_32 = arith.constant dense<0.000000e+00> : vector<4x8xf32>
    %46 = vector.multi_reduction <add>, %45, %cst_32 [2] : vector<4x8x8xf32> to vector<4x8xf32>
    %47 = vector.shape_cast %46 : vector<4x8xf32> to vector<4x8x1xf32>
    %48 = tpu.reciprocal %47 {approx = true} : vector<4x8x1xf32> -> vector<4x8x1xf32>
    %49 = vector.broadcast %48 : vector<4x8x1xf32> to vector<4x8x8xf32>
    %50 = arith.mulf %45, %49 : vector<4x8x8xf32>
    %51 = arith.truncf %50 : vector<4x8x8xf32> to vector<4x8x8xbf16>
    %52 = arith.truncf %26 : vector<4x8x8xf32> to vector<4x8x8xbf16>
    %cst_33 = arith.constant dense<0.000000e+00> : vector<4x8x8xf32>
    %53 = tpu.matmul %51, %52, %cst_33 {dimension_numbers = #tpu.dot_dimension_numbers<[2], [1], [1], [2], [0, 0, 0, 1, 1, 2], [0], [0]>} : vector<4x8x8xbf16>, vector<4x8x8xbf16>, vector<4x8x8xf32> -> vector<4x8x8xf32>
    %54 = arith.truncf %53 : vector<4x8x8xf32> to vector<4x8x8xbf16>
    %c0_34 = arith.constant 0 : index
    %c0_35 = arith.constant 0 : index
    %c0_36 = arith.constant 0 : index
    %55 = vector.load %arg10[%c0_34, %c0_35, %c0_36] : memref<4x8x32xbf16, #tpu.memory_space<vmem>>, vector<4x8x32xbf16>
    %cst_37 = arith.constant dense<0.000000e+00> : vector<4x8x32xf32>
    %56 = tpu.matmul %54, %55, %cst_37 {dimension_numbers = #tpu.dot_dimension_numbers<[2], [1], [1], [2], [0, 0, 0, 1, 1, 2], [0], [0]>} : vector<4x8x8xbf16>, vector<4x8x32xbf16>, vector<4x8x32xf32> -> vector<4x8x32xf32>
    %cst_38 = arith.constant dense<0.000000e+00> : vector<8x32xf32>
    %57 = vector.multi_reduction <add>, %56, %cst_38 [0] : vector<4x8x32xf32> to vector<8x32xf32>
    %c0_39 = arith.constant 0 : index
    %c0_40 = arith.constant 0 : index
    %58 = vector.load %arg11[%c0_39, %c0_40] : memref<1x32xf32, #tpu.memory_space<vmem>>, vector<1x32xf32>
    %59 = vector.broadcast %58 : vector<1x32xf32> to vector<8x32xf32>
    %60 = arith.addf %57, %59 : vector<8x32xf32>
    %61 = arith.addf %60, %1 : vector<8x32xf32>
    %cst_41 = arith.constant dense<0.000000e+00> : vector<8xf32>
    %62 = vector.multi_reduction <add>, %61, %cst_41 [1] : vector<8x32xf32> to vector<8xf32>
    %63 = vector.shape_cast %62 : vector<8xf32> to vector<8x1xf32>
    %cst_42 = arith.constant 3.200000e+01 : f32
    %64 = vector.broadcast %cst_42 : f32 to vector<8x1xf32>
    %65 = arith.divf %63, %64 : vector<8x1xf32>
    %66 = vector.broadcast %65 : vector<8x1xf32> to vector<8x32xf32>
    %67 = arith.subf %61, %66 : vector<8x32xf32>
    %68 = arith.mulf %67, %67 : vector<8x32xf32>
    %cst_43 = arith.constant dense<0.000000e+00> : vector<8xf32>
    %69 = vector.multi_reduction <add>, %68, %cst_43 [1] : vector<8x32xf32> to vector<8xf32>
    %70 = vector.shape_cast %69 : vector<8xf32> to vector<8x1xf32>
    %cst_44 = arith.constant 3.200000e+01 : f32
    %71 = vector.broadcast %cst_44 : f32 to vector<8x1xf32>
    %72 = arith.divf %70, %71 : vector<8x1xf32>
    %73 = vector.broadcast %65 : vector<8x1xf32> to vector<8x32xf32>
    %74 = arith.subf %61, %73 : vector<8x32xf32>
    %cst_45 = arith.constant 9.99999974E-6 : f32
    %75 = vector.broadcast %cst_45 : f32 to vector<8x1xf32>
    %76 = arith.addf %72, %75 : vector<8x1xf32>
    %77 = math.rsqrt %76 : vector<8x1xf32>
    %78 = vector.broadcast %77 : vector<8x1xf32> to vector<8x32xf32>
    %79 = arith.mulf %74, %78 : vector<8x32xf32>
    %c0_46 = arith.constant 0 : index
    %c0_47 = arith.constant 0 : index
    %80 = vector.load %arg12[%c0_46, %c0_47] : memref<1x32xf32, #tpu.memory_space<vmem>>, vector<1x32xf32>
    %81 = vector.broadcast %80 : vector<1x32xf32> to vector<8x32xf32>
    %82 = arith.mulf %79, %81 : vector<8x32xf32>
    %c0_48 = arith.constant 0 : index
    %c0_49 = arith.constant 0 : index
    %83 = vector.load %arg13[%c0_48, %c0_49] : memref<1x32xf32, #tpu.memory_space<vmem>>, vector<1x32xf32>
    %84 = vector.broadcast %83 : vector<1x32xf32> to vector<8x32xf32>
    %85 = arith.addf %82, %84 : vector<8x32xf32>
    %c0_50 = arith.constant 0 : index
    %c0_51 = arith.constant 0 : index
    %c0_52 = arith.constant 0 : index
    %86 = vector.load %arg14[%c0_50, %c0_51, %c0_52] : memref<1x8x32xf32, #tpu.memory_space<vmem>>, vector<1x8x32xf32>
    %87 = vector.shape_cast %86 : vector<1x8x32xf32> to vector<8x32xf32>
    %88 = vector.shape_cast %85 : vector<8x32xf32> to vector<1x8x32xf32>
    tpu.vector_store %arg14[%c0_50, %c0_51, %c0_52], %88 {strides = array<i32>} : memref<1x8x32xf32, #tpu.memory_space<vmem>>, vector<1x8x32xf32>,
    return
  }
  func.func @transform_0(%arg0: i32) -> (i32, i32, i32) {
    %c0_i32 = arith.constant 0 : i32
    %c0_i32_0 = arith.constant 0 : i32
    %c0_i32_1 = arith.constant 0 : i32
    return %arg0, %c0_i32, %c0_i32_0 : i32, i32, i32
  }
  func.func @transform_1(%arg0: i32) -> (i32, i32, i32) {
    %c0_i32 = arith.constant 0 : i32
    %c0_i32_0 = arith.constant 0 : i32
    %c0_i32_1 = arith.constant 0 : i32
    return %arg0, %c0_i32, %c0_i32_0 : i32, i32, i32
  }
  func.func @transform_2(%arg0: i32) -> (i32, i32, i32) {
    %c0_i32 = arith.constant 0 : i32
    %c0_i32_0 = arith.constant 0 : i32
    %c0_i32_1 = arith.constant 0 : i32
    return %arg0, %c0_i32, %c0_i32_0 : i32, i32, i32
  }
  func.func @transform_3(%arg0: i32) -> (i32, i32, i32) {
    %c0_i32 = arith.constant 0 : i32
    %c0_i32_0 = arith.constant 0 : i32
    %c0_i32_1 = arith.constant 0 : i32
    %c0_i32_2 = arith.constant 0 : i32
    return %c0_i32, %c0_i32_0, %c0_i32_1 : i32, i32, i32
  }
  func.func @transform_4(%arg0: i32) -> (i32, i32, i32) {
    %c0_i32 = arith.constant 0 : i32
    %c0_i32_0 = arith.constant 0 : i32
    %c0_i32_1 = arith.constant 0 : i32
    %c0_i32_2 = arith.constant 0 : i32
    return %c0_i32, %c0_i32_0, %c0_i32_1 : i32, i32, i32
  }
  func.func @transform_5(%arg0: i32) -> (i32, i32, i32) {
    %c0_i32 = arith.constant 0 : i32
    %c0_i32_0 = arith.constant 0 : i32
    %c0_i32_1 = arith.constant 0 : i32
    %c0_i32_2 = arith.constant 0 : i32
    return %c0_i32, %c0_i32_0, %c0_i32_1 : i32, i32, i32
  }
  func.func @transform_6(%arg0: i32) -> (i32, i32, i32) {
    %c0_i32 = arith.constant 0 : i32
    %c0_i32_0 = arith.constant 0 : i32
    %c0_i32_1 = arith.constant 0 : i32
    %c0_i32_2 = arith.constant 0 : i32
    return %c0_i32, %c0_i32_0, %c0_i32_1 : i32, i32, i32
  }
  func.func @transform_7(%arg0: i32) -> (i32, i32, i32) {
    %c0_i32 = arith.constant 0 : i32
    %c0_i32_0 = arith.constant 0 : i32
    %c0_i32_1 = arith.constant 0 : i32
    %c0_i32_2 = arith.constant 0 : i32
    return %c0_i32, %c0_i32_0, %c0_i32_1 : i32, i32, i32
  }
  func.func @transform_8(%arg0: i32) -> (i32, i32, i32) {
    %c0_i32 = arith.constant 0 : i32
    %c0_i32_0 = arith.constant 0 : i32
    %c0_i32_1 = arith.constant 0 : i32
    %c0_i32_2 = arith.constant 0 : i32
    return %c0_i32, %c0_i32_0, %c0_i32_1 : i32, i32, i32
  }
  func.func @transform_9(%arg0: i32) -> (i32, i32, i32) {
    %c0_i32 = arith.constant 0 : i32
    %c0_i32_0 = arith.constant 0 : i32
    %c0_i32_1 = arith.constant 0 : i32
    %c0_i32_2 = arith.constant 0 : i32
    return %c0_i32, %c0_i32_0, %c0_i32_1 : i32, i32, i32
  }
  func.func @transform_10(%arg0: i32) -> (i32, i32) {
    %c0_i32 = arith.constant 0 : i32
    %c0_i32_0 = arith.constant 0 : i32
    %c0_i32_1 = arith.constant 0 : i32
    return %c0_i32, %c0_i32_0 : i32, i32
  }
  func.func @transform_11(%arg0: i32) -> (i32, i32) {
    %c0_i32 = arith.constant 0 : i32
    %c0_i32_0 = arith.constant 0 : i32
    %c0_i32_1 = arith.constant 0 : i32
    return %c0_i32, %c0_i32_0 : i32, i32
  }
  func.func @transform_12(%arg0: i32) -> (i32, i32) {
    %c0_i32 = arith.constant 0 : i32
    %c0_i32_0 = arith.constant 0 : i32
    %c0_i32_1 = arith.constant 0 : i32
    return %c0_i32, %c0_i32_0 : i32, i32
  }
  func.func @transform_13(%arg0: i32) -> (i32, i32, i32) {
    %c0_i32 = arith.constant 0 : i32
    %c0_i32_0 = arith.constant 0 : i32
    %c0_i32_1 = arith.constant 0 : i32
    return %arg0, %c0_i32, %c0_i32_0 : i32, i32, i32
  }
}

module attributes {stable_mosaic.version = 11 : i64} {
  func.func @_ffn_block_kernel(%arg0: i32, %arg1: memref<16x32xf32, #tpu.memory_space<vmem>>, %arg2: memref<32x64xbf16, #tpu.memory_space<vmem>>, %arg3: memref<1x64xf32, #tpu.memory_space<vmem>>, %arg4: memref<64x32xbf16, #tpu.memory_space<vmem>>, %arg5: memref<1x32xf32, #tpu.memory_space<vmem>>, %arg6: memref<1x32xf32, #tpu.memory_space<vmem>>, %arg7: memref<1x32xf32, #tpu.memory_space<vmem>>, %arg8: memref<16x32xf32, #tpu.memory_space<vmem>>) attributes {dimension_semantics = [#tpu.dimension_semantics<parallel>], iteration_bounds = array<i64: 1>, scalar_prefetch = 0 : i64, scratch_operands = 0 : i64, tpu.core_type = #tpu.core_type<tc>, window_params = [{transform_indices = @transform_0, window_bounds = array<i64: 16, 32>}, {pipeline_mode = #tpu.pipeline_mode<synchronous>, transform_indices = @transform_1, window_bounds = array<i64: 32, 64>}, {pipeline_mode = #tpu.pipeline_mode<synchronous>, transform_indices = @transform_2, window_bounds = array<i64: 1, 64>}, {pipeline_mode = #tpu.pipeline_mode<synchronous>, transform_indices = @transform_3, window_bounds = array<i64: 64, 32>}, {pipeline_mode = #tpu.pipeline_mode<synchronous>, transform_indices = @transform_4, window_bounds = array<i64: 1, 32>}, {pipeline_mode = #tpu.pipeline_mode<synchronous>, transform_indices = @transform_5, window_bounds = array<i64: 1, 32>}, {pipeline_mode = #tpu.pipeline_mode<synchronous>, transform_indices = @transform_6, window_bounds = array<i64: 1, 32>}, {transform_indices = @transform_7, window_bounds = array<i64: 16, 32>}]} {
    %c0 = arith.constant 0 : index
    %c0_0 = arith.constant 0 : index
    %0 = vector.load %arg1[%c0, %c0_0] : memref<16x32xf32, #tpu.memory_space<vmem>>, vector<16x32xf32>
    %1 = arith.truncf %0 : vector<16x32xf32> to vector<16x32xbf16>
    %c0_1 = arith.constant 0 : index
    %c0_2 = arith.constant 0 : index
    %2 = vector.load %arg2[%c0_1, %c0_2] : memref<32x64xbf16, #tpu.memory_space<vmem>>, vector<32x64xbf16>
    %cst = arith.constant dense<0.000000e+00> : vector<16x64xf32>
    %3 = tpu.matmul %1, %2, %cst {dimension_numbers = #tpu.dot_dimension_numbers<[1], [0], [0], [1], [0, 0, 1, 1], [], []>} : vector<16x32xbf16>, vector<32x64xbf16>, vector<16x64xf32> -> vector<16x64xf32>
    %c0_3 = arith.constant 0 : index
    %c0_4 = arith.constant 0 : index
    %4 = vector.load %arg3[%c0_3, %c0_4] : memref<1x64xf32, #tpu.memory_space<vmem>>, vector<1x64xf32>
    %5 = vector.broadcast %4 : vector<1x64xf32> to vector<16x64xf32>
    %6 = arith.addf %3, %5 : vector<16x64xf32>
    %cst_5 = arith.constant 0.000000e+00 : f32
    %7 = vector.broadcast %cst_5 : f32 to vector<16x64xf32>
    %8 = arith.maximumf %6, %7 : vector<16x64xf32>
    %9 = arith.truncf %8 : vector<16x64xf32> to vector<16x64xbf16>
    %c0_6 = arith.constant 0 : index
    %c0_7 = arith.constant 0 : index
    %10 = vector.load %arg4[%c0_6, %c0_7] : memref<64x32xbf16, #tpu.memory_space<vmem>>, vector<64x32xbf16>
    %cst_8 = arith.constant dense<0.000000e+00> : vector<16x32xf32>
    %11 = tpu.matmul %9, %10, %cst_8 {dimension_numbers = #tpu.dot_dimension_numbers<[1], [0], [0], [1], [0, 0, 1, 1], [], []>} : vector<16x64xbf16>, vector<64x32xbf16>, vector<16x32xf32> -> vector<16x32xf32>
    %c0_9 = arith.constant 0 : index
    %c0_10 = arith.constant 0 : index
    %12 = vector.load %arg5[%c0_9, %c0_10] : memref<1x32xf32, #tpu.memory_space<vmem>>, vector<1x32xf32>
    %13 = vector.broadcast %12 : vector<1x32xf32> to vector<16x32xf32>
    %14 = arith.addf %11, %13 : vector<16x32xf32>
    %15 = arith.addf %14, %0 : vector<16x32xf32>
    %cst_11 = arith.constant dense<0.000000e+00> : vector<16xf32>
    %16 = vector.multi_reduction <add>, %15, %cst_11 [1] : vector<16x32xf32> to vector<16xf32>
    %17 = vector.shape_cast %16 : vector<16xf32> to vector<16x1xf32>
    %cst_12 = arith.constant 3.200000e+01 : f32
    %18 = vector.broadcast %cst_12 : f32 to vector<16x1xf32>
    %19 = arith.divf %17, %18 : vector<16x1xf32>
    %20 = vector.broadcast %19 : vector<16x1xf32> to vector<16x32xf32>
    %21 = arith.subf %15, %20 : vector<16x32xf32>
    %22 = arith.mulf %21, %21 : vector<16x32xf32>
    %cst_13 = arith.constant dense<0.000000e+00> : vector<16xf32>
    %23 = vector.multi_reduction <add>, %22, %cst_13 [1] : vector<16x32xf32> to vector<16xf32>
    %24 = vector.shape_cast %23 : vector<16xf32> to vector<16x1xf32>
    %cst_14 = arith.constant 3.200000e+01 : f32
    %25 = vector.broadcast %cst_14 : f32 to vector<16x1xf32>
    %26 = arith.divf %24, %25 : vector<16x1xf32>
    %27 = vector.broadcast %19 : vector<16x1xf32> to vector<16x32xf32>
    %28 = arith.subf %15, %27 : vector<16x32xf32>
    %cst_15 = arith.constant 9.99999974E-6 : f32
    %29 = vector.broadcast %cst_15 : f32 to vector<16x1xf32>
    %30 = arith.addf %26, %29 : vector<16x1xf32>
    %31 = math.rsqrt %30 : vector<16x1xf32>
    %32 = vector.broadcast %31 : vector<16x1xf32> to vector<16x32xf32>
    %33 = arith.mulf %28, %32 : vector<16x32xf32>
    %c0_16 = arith.constant 0 : index
    %c0_17 = arith.constant 0 : index
    %34 = vector.load %arg6[%c0_16, %c0_17] : memref<1x32xf32, #tpu.memory_space<vmem>>, vector<1x32xf32>
    %35 = vector.broadcast %34 : vector<1x32xf32> to vector<16x32xf32>
    %36 = arith.mulf %33, %35 : vector<16x32xf32>
    %c0_18 = arith.constant 0 : index
    %c0_19 = arith.constant 0 : index
    %37 = vector.load %arg7[%c0_18, %c0_19] : memref<1x32xf32, #tpu.memory_space<vmem>>, vector<1x32xf32>
    %38 = vector.broadcast %37 : vector<1x32xf32> to vector<16x32xf32>
    %39 = arith.addf %36, %38 : vector<16x32xf32>
    %c0_20 = arith.constant 0 : index
    %c0_21 = arith.constant 0 : index
    %40 = vector.load %arg8[%c0_20, %c0_21] : memref<16x32xf32, #tpu.memory_space<vmem>>, vector<16x32xf32>
    tpu.vector_store %arg8[%c0_20, %c0_21], %39 {strides = array<i32>} : memref<16x32xf32, #tpu.memory_space<vmem>>, vector<16x32xf32>,
    return
  }
  func.func @transform_0(%arg0: i32) -> (i32, i32) {
    %c0_i32 = arith.constant 0 : i32
    %c0_i32_0 = arith.constant 0 : i32
    return %arg0, %c0_i32 : i32, i32
  }
  func.func @transform_1(%arg0: i32) -> (i32, i32) {
    %c0_i32 = arith.constant 0 : i32
    %c0_i32_0 = arith.constant 0 : i32
    %c0_i32_1 = arith.constant 0 : i32
    return %c0_i32, %c0_i32_0 : i32, i32
  }
  func.func @transform_2(%arg0: i32) -> (i32, i32) {
    %c0_i32 = arith.constant 0 : i32
    %c0_i32_0 = arith.constant 0 : i32
    %c0_i32_1 = arith.constant 0 : i32
    return %c0_i32, %c0_i32_0 : i32, i32
  }
  func.func @transform_3(%arg0: i32) -> (i32, i32) {
    %c0_i32 = arith.constant 0 : i32
    %c0_i32_0 = arith.constant 0 : i32
    %c0_i32_1 = arith.constant 0 : i32
    return %c0_i32, %c0_i32_0 : i32, i32
  }
  func.func @transform_4(%arg0: i32) -> (i32, i32) {
    %c0_i32 = arith.constant 0 : i32
    %c0_i32_0 = arith.constant 0 : i32
    %c0_i32_1 = arith.constant 0 : i32
    return %c0_i32, %c0_i32_0 : i32, i32
  }
  func.func @transform_5(%arg0: i32) -> (i32, i32) {
    %c0_i32 = arith.constant 0 : i32
    %c0_i32_0 = arith.constant 0 : i32
    %c0_i32_1 = arith.constant 0 : i32
    return %c0_i32, %c0_i32_0 : i32, i32
  }
  func.func @transform_6(%arg0: i32) -> (i32, i32) {
    %c0_i32 = arith.constant 0 : i32
    %c0_i32_0 = arith.constant 0 : i32
    %c0_i32_1 = arith.constant 0 : i32
    return %c0_i32, %c0_i32_0 : i32, i32
  }
  func.func @transform_7(%arg0: i32) -> (i32, i32) {
    %c0_i32 = arith.constant 0 : i32
    %c0_i32_0 = arith.constant 0 : i32
    return %arg0, %c0_i32 : i32, i32
  }
}

module attributes {stable_mosaic.version = 11 : i64} {
  func.func @_attn_block_kernel(%arg0: i32, %arg1: memref<1x8x32xf32, #tpu.memory_space<vmem>>, %arg2: memref<1x8x32xf32, #tpu.memory_space<vmem>>, %arg3: memref<1x8x8xi32, #tpu.memory_space<vmem>>, %arg4: memref<4x32x8xbf16, #tpu.memory_space<vmem>>, %arg5: memref<4x32x8xbf16, #tpu.memory_space<vmem>>, %arg6: memref<4x32x8xbf16, #tpu.memory_space<vmem>>, %arg7: memref<4x1x8xf32, #tpu.memory_space<vmem>>, %arg8: memref<4x1x8xf32, #tpu.memory_space<vmem>>, %arg9: memref<4x1x8xf32, #tpu.memory_space<vmem>>, %arg10: memref<4x8x32xbf16, #tpu.memory_space<vmem>>, %arg11: memref<1x32xf32, #tpu.memory_space<vmem>>, %arg12: memref<1x32xf32, #tpu.memory_space<vmem>>, %arg13: memref<1x32xf32, #tpu.memory_space<vmem>>, %arg14: memref<1x8x32xf32, #tpu.memory_space<vmem>>) attributes {dimension_semantics = [#tpu.dimension_semantics<parallel>], iteration_bounds = array<i64: 2>, scalar_prefetch = 0 : i64, scratch_operands = 0 : i64, tpu.core_type = #tpu.core_type<tc>, window_params = [{transform_indices = @transform_0, window_bounds = array<i64: 1, 8, 32>}, {transform_indices = @transform_1, window_bounds = array<i64: 1, 8, 32>}, {transform_indices = @transform_2, window_bounds = array<i64: 1, 8, 8>}, {pipeline_mode = #tpu.pipeline_mode<synchronous>, transform_indices = @transform_3, window_bounds = array<i64: 4, 32, 8>}, {pipeline_mode = #tpu.pipeline_mode<synchronous>, transform_indices = @transform_4, window_bounds = array<i64: 4, 32, 8>}, {pipeline_mode = #tpu.pipeline_mode<synchronous>, transform_indices = @transform_5, window_bounds = array<i64: 4, 32, 8>}, {pipeline_mode = #tpu.pipeline_mode<synchronous>, transform_indices = @transform_6, window_bounds = array<i64: 4, 1, 8>}, {pipeline_mode = #tpu.pipeline_mode<synchronous>, transform_indices = @transform_7, window_bounds = array<i64: 4, 1, 8>}, {pipeline_mode = #tpu.pipeline_mode<synchronous>, transform_indices = @transform_8, window_bounds = array<i64: 4, 1, 8>}, {pipeline_mode = #tpu.pipeline_mode<synchronous>, transform_indices = @transform_9, window_bounds = array<i64: 4, 8, 32>}, {pipeline_mode = #tpu.pipeline_mode<synchronous>, transform_indices = @transform_10, window_bounds = array<i64: 1, 32>}, {pipeline_mode = #tpu.pipeline_mode<synchronous>, transform_indices = @transform_11, window_bounds = array<i64: 1, 32>}, {pipeline_mode = #tpu.pipeline_mode<synchronous>, transform_indices = @transform_12, window_bounds = array<i64: 1, 32>}, {transform_indices = @transform_13, window_bounds = array<i64: 1, 8, 32>}]} {
    %c0 = arith.constant 0 : index
    %c0_0 = arith.constant 0 : index
    %c0_1 = arith.constant 0 : index
    %0 = vector.load %arg1[%c0, %c0_0, %c0_1] : memref<1x8x32xf32, #tpu.memory_space<vmem>>, vector<1x8x32xf32>
    %1 = vector.shape_cast %0 : vector<1x8x32xf32> to vector<8x32xf32>
    %c0_2 = arith.constant 0 : index
    %c0_3 = arith.constant 0 : index
    %c0_4 = arith.constant 0 : index
    %2 = vector.load %arg2[%c0_2, %c0_3, %c0_4] : memref<1x8x32xf32, #tpu.memory_space<vmem>>, vector<1x8x32xf32>
    %3 = vector.shape_cast %2 : vector<1x8x32xf32> to vector<8x32xf32>
    %4 = arith.truncf %1 : vector<8x32xf32> to vector<8x32xbf16>
    %5 = vector.shape_cast %4 : vector<8x32xbf16> to vector<1x8x32xbf16>
    %6 = vector.shape_cast %5 : vector<1x8x32xbf16> to vector<1x8x32xbf16>
    %7 = vector.broadcast %6 : vector<1x8x32xbf16> to vector<4x8x32xbf16>
    %8 = arith.truncf %3 : vector<8x32xf32> to vector<8x32xbf16>
    %9 = vector.shape_cast %8 : vector<8x32xbf16> to vector<1x8x32xbf16>
    %10 = vector.shape_cast %9 : vector<1x8x32xbf16> to vector<1x8x32xbf16>
    %11 = vector.broadcast %10 : vector<1x8x32xbf16> to vector<4x8x32xbf16>
    %c0_5 = arith.constant 0 : index
    %c0_6 = arith.constant 0 : index
    %c0_7 = arith.constant 0 : index
    %12 = vector.load %arg4[%c0_5, %c0_6, %c0_7] : memref<4x32x8xbf16, #tpu.memory_space<vmem>>, vector<4x32x8xbf16>
    %cst = arith.constant dense<0.000000e+00> : vector<4x8x8xf32>
    %13 = tpu.matmul %7, %12, %cst {dimension_numbers = #tpu.dot_dimension_numbers<[2], [1], [1], [2], [0, 0, 0, 1, 1, 2], [0], [0]>} : vector<4x8x32xbf16>, vector<4x32x8xbf16>, vector<4x8x8xf32> -> vector<4x8x8xf32>
    %c0_8 = arith.constant 0 : index
    %c0_9 = arith.constant 0 : index
    %c0_10 = arith.constant 0 : index
    %14 = vector.load %arg7[%c0_8, %c0_9, %c0_10] : memref<4x1x8xf32, #tpu.memory_space<vmem>>, vector<4x1x8xf32>
    %15 = vector.broadcast %14 : vector<4x1x8xf32> to vector<4x8x8xf32>
    %16 = arith.addf %13, %15 : vector<4x8x8xf32>
    %c0_11 = arith.constant 0 : index
    %c0_12 = arith.constant 0 : index
    %c0_13 = arith.constant 0 : index
    %17 = vector.load %arg5[%c0_11, %c0_12, %c0_13] : memref<4x32x8xbf16, #tpu.memory_space<vmem>>, vector<4x32x8xbf16>
    %cst_14 = arith.constant dense<0.000000e+00> : vector<4x8x8xf32>
    %18 = tpu.matmul %11, %17, %cst_14 {dimension_numbers = #tpu.dot_dimension_numbers<[2], [1], [1], [2], [0, 0, 0, 1, 1, 2], [0], [0]>} : vector<4x8x32xbf16>, vector<4x32x8xbf16>, vector<4x8x8xf32> -> vector<4x8x8xf32>
    %c0_15 = arith.constant 0 : index
    %c0_16 = arith.constant 0 : index
    %c0_17 = arith.constant 0 : index
    %19 = vector.load %arg8[%c0_15, %c0_16, %c0_17] : memref<4x1x8xf32, #tpu.memory_space<vmem>>, vector<4x1x8xf32>
    %20 = vector.broadcast %19 : vector<4x1x8xf32> to vector<4x8x8xf32>
    %21 = arith.addf %18, %20 : vector<4x8x8xf32>
    %c0_18 = arith.constant 0 : index
    %c0_19 = arith.constant 0 : index
    %c0_20 = arith.constant 0 : index
    %22 = vector.load %arg6[%c0_18, %c0_19, %c0_20] : memref<4x32x8xbf16, #tpu.memory_space<vmem>>, vector<4x32x8xbf16>
    %cst_21 = arith.constant dense<0.000000e+00> : vector<4x8x8xf32>
    %23 = tpu.matmul %11, %22, %cst_21 {dimension_numbers = #tpu.dot_dimension_numbers<[2], [1], [1], [2], [0, 0, 0, 1, 1, 2], [0], [0]>} : vector<4x8x32xbf16>, vector<4x32x8xbf16>, vector<4x8x8xf32> -> vector<4x8x8xf32>
    %c0_22 = arith.constant 0 : index
    %c0_23 = arith.constant 0 : index
    %c0_24 = arith.constant 0 : index
    %24 = vector.load %arg9[%c0_22, %c0_23, %c0_24] : memref<4x1x8xf32, #tpu.memory_space<vmem>>, vector<4x1x8xf32>
    %25 = vector.broadcast %24 : vector<4x1x8xf32> to vector<4x8x8xf32>
    %26 = arith.addf %23, %25 : vector<4x8x8xf32>
    %27 = arith.truncf %16 : vector<4x8x8xf32> to vector<4x8x8xbf16>
    %28 = arith.truncf %21 : vector<4x8x8xf32> to vector<4x8x8xbf16>
    %cst_25 = arith.constant dense<0.000000e+00> : vector<4x8x8xf32>
    %29 = tpu.matmul %27, %28, %cst_25 {dimension_numbers = #tpu.dot_dimension_numbers<[2], [2], [1], [1], [0, 0, 0, 1, 1, 1], [0], [0]>} : vector<4x8x8xbf16>, vector<4x8x8xbf16>, vector<4x8x8xf32> -> vector<4x8x8xf32>
    %cst_26 = arith.constant 0.353553385 : f32
    %30 = vector.broadcast %cst_26 : f32 to vector<4x8x8xf32>
    %31 = arith.mulf %29, %30 : vector<4x8x8xf32>
    %c0_27 = arith.constant 0 : index
    %c0_28 = arith.constant 0 : index
    %c0_29 = arith.constant 0 : index
    %32 = vector.load %arg3[%c0_27, %c0_28, %c0_29] : memref<1x8x8xi32, #tpu.memory_space<vmem>>, vector<1x8x8xi32>
    %33 = vector.shape_cast %32 : vector<1x8x8xi32> to vector<8x8xi32>
    %34 = vector.shape_cast %33 : vector<8x8xi32> to vector<1x8x8xi32>
    %c0_i32 = arith.constant 0 : i32
    %35 = vector.broadcast %c0_i32 : i32 to vector<1x8x8xi32>
    %36 = arith.cmpi eq, %34, %35 : vector<1x8x8xi32>
    %cst_30 = arith.constant -1.000000e+09 : f32
    %37 = vector.shape_cast %36 : vector<1x8x8xi1> to vector<1x8x8xi1>
    %38 = vector.broadcast %37 : vector<1x8x8xi1> to vector<4x8x8xi1>
    %39 = vector.broadcast %cst_30 : f32 to vector<4x8x8xf32>
    %40 = arith.select %38, %39, %31 : vector<4x8x8xi1>, vector<4x8x8xf32>
    %cst_31 = arith.constant dense<0xFF800000> : vector<4x8xf32>
    %41 = vector.multi_reduction <maximumf>, %40, %cst_31 [2] : vector<4x8x8xf32> to vector<4x8xf32>
    %42 = vector.shape_cast %41 : vector<4x8xf32> to vector<4x8x1xf32>
    %43 = vector.broadcast %42 : vector<4x8x1xf32> to vector<4x8x8xf32>
    %44 = arith.subf %40, %43 : vector<4x8x8xf32>
    %45 = math.exp %44 : vector<4x8x8xf32>
    %cst_32 = arith.constant dense<0.000000e+00> : vector<4x8xf32>
    %46 = vector.multi_reduction <add>, %45, %cst_32 [2] : vector<4x8x8xf32> to vector<4x8xf32>
    %47 = vector.shape_cast %46 : vector<4x8xf32> to vector<4x8x1xf32>
    %48 = tpu.reciprocal %47 {approx = true} : vector<4x8x1xf32> -> vector<4x8x1xf32>
    %49 = vector.broadcast %48 : vector<4x8x1xf32> to vector<4x8x8xf32>
    %50 = arith.mulf %45, %49 : vector<4x8x8xf32>
    %51 = arith.truncf %50 : vector<4x8x8xf32> to vector<4x8x8xbf16>
    %52 = arith.truncf %26 : vector<4x8x8xf32> to vector<4x8x8xbf16>
    %cst_33 = arith.constant dense<0.000000e+00> : vector<4x8x8xf32>
    %53 = tpu.matmul %51, %52, %cst_33 {dimension_numbers = #tpu.dot_dimension_numbers<[2], [1], [1], [2], [0, 0, 0, 1, 1, 2], [0], [0]>} : vector<4x8x8xbf16>, vector<4x8x8xbf16>, vector<4x8x8xf32> -> vector<4x8x8xf32>
    %54 = arith.truncf %53 : vector<4x8x8xf32> to vector<4x8x8xbf16>
    %c0_34 = arith.constant 0 : index
    %c0_35 = arith.constant 0 : index
    %c0_36 = arith.constant 0 : index
    %55 = vector.load %arg10[%c0_34, %c0_35, %c0_36] : memref<4x8x32xbf16, #tpu.memory_space<vmem>>, vector<4x8x32xbf16>
    %cst_37 = arith.constant dense<0.000000e+00> : vector<4x8x32xf32>
    %56 = tpu.matmul %54, %55, %cst_37 {dimension_numbers = #tpu.dot_dimension_numbers<[2], [1], [1], [2], [0, 0, 0, 1, 1, 2], [0], [0]>} : vector<4x8x8xbf16>, vector<4x8x32xbf16>, vector<4x8x32xf32> -> vector<4x8x32xf32>
    %cst_38 = arith.constant dense<0.000000e+00> : vector<8x32xf32>
    %57 = vector.multi_reduction <add>, %56, %cst_38 [0] : vector<4x8x32xf32> to vector<8x32xf32>
    %c0_39 = arith.constant 0 : index
    %c0_40 = arith.constant 0 : index
    %58 = vector.load %arg11[%c0_39, %c0_40] : memref<1x32xf32, #tpu.memory_space<vmem>>, vector<1x32xf32>
    %59 = vector.broadcast %58 : vector<1x32xf32> to vector<8x32xf32>
    %60 = arith.addf %57, %59 : vector<8x32xf32>
    %61 = arith.addf %60, %1 : vector<8x32xf32>
    %cst_41 = arith.constant dense<0.000000e+00> : vector<8xf32>
    %62 = vector.multi_reduction <add>, %61, %cst_41 [1] : vector<8x32xf32> to vector<8xf32>
    %63 = vector.shape_cast %62 : vector<8xf32> to vector<8x1xf32>
    %cst_42 = arith.constant 3.200000e+01 : f32
    %64 = vector.broadcast %cst_42 : f32 to vector<8x1xf32>
    %65 = arith.divf %63, %64 : vector<8x1xf32>
    %66 = vector.broadcast %65 : vector<8x1xf32> to vector<8x32xf32>
    %67 = arith.subf %61, %66 : vector<8x32xf32>
    %68 = arith.mulf %67, %67 : vector<8x32xf32>
    %cst_43 = arith.constant dense<0.000000e+00> : vector<8xf32>
    %69 = vector.multi_reduction <add>, %68, %cst_43 [1] : vector<8x32xf32> to vector<8xf32>
    %70 = vector.shape_cast %69 : vector<8xf32> to vector<8x1xf32>
    %cst_44 = arith.constant 3.200000e+01 : f32
    %71 = vector.broadcast %cst_44 : f32 to vector<8x1xf32>
    %72 = arith.divf %70, %71 : vector<8x1xf32>
    %73 = vector.broadcast %65 : vector<8x1xf32> to vector<8x32xf32>
    %74 = arith.subf %61, %73 : vector<8x32xf32>
    %cst_45 = arith.constant 9.99999974E-6 : f32
    %75 = vector.broadcast %cst_45 : f32 to vector<8x1xf32>
    %76 = arith.addf %72, %75 : vector<8x1xf32>
    %77 = math.rsqrt %76 : vector<8x1xf32>
    %78 = vector.broadcast %77 : vector<8x1xf32> to vector<8x32xf32>
    %79 = arith.mulf %74, %78 : vector<8x32xf32>
    %c0_46 = arith.constant 0 : index
    %c0_47 = arith.constant 0 : index
    %80 = vector.load %arg12[%c0_46, %c0_47] : memref<1x32xf32, #tpu.memory_space<vmem>>, vector<1x32xf32>
    %81 = vector.broadcast %80 : vector<1x32xf32> to vector<8x32xf32>
    %82 = arith.mulf %79, %81 : vector<8x32xf32>
    %c0_48 = arith.constant 0 : index
    %c0_49 = arith.constant 0 : index
    %83 = vector.load %arg13[%c0_48, %c0_49] : memref<1x32xf32, #tpu.memory_space<vmem>>, vector<1x32xf32>
    %84 = vector.broadcast %83 : vector<1x32xf32> to vector<8x32xf32>
    %85 = arith.addf %82, %84 : vector<8x32xf32>
    %c0_50 = arith.constant 0 : index
    %c0_51 = arith.constant 0 : index
    %c0_52 = arith.constant 0 : index
    %86 = vector.load %arg14[%c0_50, %c0_51, %c0_52] : memref<1x8x32xf32, #tpu.memory_space<vmem>>, vector<1x8x32xf32>
    %87 = vector.shape_cast %86 : vector<1x8x32xf32> to vector<8x32xf32>
    %88 = vector.shape_cast %85 : vector<8x32xf32> to vector<1x8x32xf32>
    tpu.vector_store %arg14[%c0_50, %c0_51, %c0_52], %88 {strides = array<i32>} : memref<1x8x32xf32, #tpu.memory_space<vmem>>, vector<1x8x32xf32>,
    return
  }
  func.func @transform_0(%arg0: i32) -> (i32, i32, i32) {
    %c0_i32 = arith.constant 0 : i32
    %c0_i32_0 = arith.constant 0 : i32
    %c0_i32_1 = arith.constant 0 : i32
    return %arg0, %c0_i32, %c0_i32_0 : i32, i32, i32
  }
  func.func @transform_1(%arg0: i32) -> (i32, i32, i32) {
    %c0_i32 = arith.constant 0 : i32
    %c0_i32_0 = arith.constant 0 : i32
    %c0_i32_1 = arith.constant 0 : i32
    return %arg0, %c0_i32, %c0_i32_0 : i32, i32, i32
  }
  func.func @transform_2(%arg0: i32) -> (i32, i32, i32) {
    %c0_i32 = arith.constant 0 : i32
    %c0_i32_0 = arith.constant 0 : i32
    %c0_i32_1 = arith.constant 0 : i32
    return %arg0, %c0_i32, %c0_i32_0 : i32, i32, i32
  }
  func.func @transform_3(%arg0: i32) -> (i32, i32, i32) {
    %c0_i32 = arith.constant 0 : i32
    %c0_i32_0 = arith.constant 0 : i32
    %c0_i32_1 = arith.constant 0 : i32
    %c0_i32_2 = arith.constant 0 : i32
    return %c0_i32, %c0_i32_0, %c0_i32_1 : i32, i32, i32
  }
  func.func @transform_4(%arg0: i32) -> (i32, i32, i32) {
    %c0_i32 = arith.constant 0 : i32
    %c0_i32_0 = arith.constant 0 : i32
    %c0_i32_1 = arith.constant 0 : i32
    %c0_i32_2 = arith.constant 0 : i32
    return %c0_i32, %c0_i32_0, %c0_i32_1 : i32, i32, i32
  }
  func.func @transform_5(%arg0: i32) -> (i32, i32, i32) {
    %c0_i32 = arith.constant 0 : i32
    %c0_i32_0 = arith.constant 0 : i32
    %c0_i32_1 = arith.constant 0 : i32
    %c0_i32_2 = arith.constant 0 : i32
    return %c0_i32, %c0_i32_0, %c0_i32_1 : i32, i32, i32
  }
  func.func @transform_6(%arg0: i32) -> (i32, i32, i32) {
    %c0_i32 = arith.constant 0 : i32
    %c0_i32_0 = arith.constant 0 : i32
    %c0_i32_1 = arith.constant 0 : i32
    %c0_i32_2 = arith.constant 0 : i32
    return %c0_i32, %c0_i32_0, %c0_i32_1 : i32, i32, i32
  }
  func.func @transform_7(%arg0: i32) -> (i32, i32, i32) {
    %c0_i32 = arith.constant 0 : i32
    %c0_i32_0 = arith.constant 0 : i32
    %c0_i32_1 = arith.constant 0 : i32
    %c0_i32_2 = arith.constant 0 : i32
    return %c0_i32, %c0_i32_0, %c0_i32_1 : i32, i32, i32
  }
  func.func @transform_8(%arg0: i32) -> (i32, i32, i32) {
    %c0_i32 = arith.constant 0 : i32
    %c0_i32_0 = arith.constant 0 : i32
    %c0_i32_1 = arith.constant 0 : i32
    %c0_i32_2 = arith.constant 0 : i32
    return %c0_i32, %c0_i32_0, %c0_i32_1 : i32, i32, i32
  }
  func.func @transform_9(%arg0: i32) -> (i32, i32, i32) {
    %c0_i32 = arith.constant 0 : i32
    %c0_i32_0 = arith.constant 0 : i32
    %c0_i32_1 = arith.constant 0 : i32
    %c0_i32_2 = arith.constant 0 : i32
    return %c0_i32, %c0_i32_0, %c0_i32_1 : i32, i32, i32
  }
  func.func @transform_10(%arg0: i32) -> (i32, i32) {
    %c0_i32 = arith.constant 0 : i32
    %c0_i32_0 = arith.constant 0 : i32
    %c0_i32_1 = arith.constant 0 : i32
    return %c0_i32, %c0_i32_0 : i32, i32
  }
  func.func @transform_11(%arg0: i32) -> (i32, i32) {
    %c0_i32 = arith.constant 0 : i32
    %c0_i32_0 = arith.constant 0 : i32
    %c0_i32_1 = arith.constant 0 : i32
    return %c0_i32, %c0_i32_0 : i32, i32
  }
  func.func @transform_12(%arg0: i32) -> (i32, i32) {
    %c0_i32 = arith.constant 0 : i32
    %c0_i32_0 = arith.constant 0 : i32
    %c0_i32_1 = arith.constant 0 : i32
    return %c0_i32, %c0_i32_0 : i32, i32
  }
  func.func @transform_13(%arg0: i32) -> (i32, i32, i32) {
    %c0_i32 = arith.constant 0 : i32
    %c0_i32_0 = arith.constant 0 : i32
    %c0_i32_1 = arith.constant 0 : i32
    return %arg0, %c0_i32, %c0_i32_0 : i32, i32, i32
  }
}

module attributes {stable_mosaic.version = 11 : i64} {
  func.func @_linear_kernel(%arg0: i32, %arg1: i32, %arg2: i32, %arg3: memref<16x32xbf16, #tpu.memory_space<vmem>>, %arg4: memref<32x128xbf16, #tpu.memory_space<vmem>>, %arg5: memref<1x128xf32, #tpu.memory_space<vmem>>, %arg6: memref<16x128xf32, #tpu.memory_space<vmem>>, %arg7: memref<16x128xf32, #tpu.memory_space<vmem>>) attributes {dimension_semantics = [#tpu.dimension_semantics<parallel>, #tpu.dimension_semantics<parallel>, #tpu.dimension_semantics<arbitrary>], iteration_bounds = array<i64: 1, 1, 1>, scalar_prefetch = 0 : i64, scratch_operands = 1 : i64, tpu.core_type = #tpu.core_type<tc>, window_params = [{transform_indices = @transform_0, window_bounds = array<i64: 16, 32>}, {transform_indices = @transform_1, window_bounds = array<i64: 32, 128>}, {transform_indices = @transform_2, window_bounds = array<i64: 1, 128>}, {transform_indices = @transform_3, window_bounds = array<i64: 16, 128>}]} {
    %c0_i32 = arith.constant 0 : i32
    %0 = arith.cmpi eq, %arg2, %c0_i32 : i32
    %1 = arith.extui %0 : i1 to i32
    %c0_i32_0 = arith.constant 0 : i32
    %2 = arith.cmpi ne, %1, %c0_i32_0 : i32
    scf.if %2 {
      %cst_10 = arith.constant 0.000000e+00 : f32
      %12 = vector.broadcast %cst_10 : f32 to vector<16x128xf32>
      %c0_11 = arith.constant 0 : index
      %c0_12 = arith.constant 0 : index
      %13 = vector.load %arg7[%c0_11, %c0_12] : memref<16x128xf32, #tpu.memory_space<vmem>>, vector<16x128xf32>
      tpu.vector_store %arg7[%c0_11, %c0_12], %12 {strides = array<i32>} : memref<16x128xf32, #tpu.memory_space<vmem>>, vector<16x128xf32>,
    } else {
    }
    %c0 = arith.constant 0 : index
    %c0_1 = arith.constant 0 : index
    %3 = vector.load %arg7[%c0, %c0_1] : memref<16x128xf32, #tpu.memory_space<vmem>>, vector<16x128xf32>
    %c0_2 = arith.constant 0 : index
    %c0_3 = arith.constant 0 : index
    %4 = vector.load %arg3[%c0_2, %c0_3] : memref<16x32xbf16, #tpu.memory_space<vmem>>, vector<16x32xbf16>
    %c0_4 = arith.constant 0 : index
    %c0_5 = arith.constant 0 : index
    %5 = vector.load %arg4[%c0_4, %c0_5] : memref<32x128xbf16, #tpu.memory_space<vmem>>, vector<32x128xbf16>
    %cst = arith.constant dense<0.000000e+00> : vector<16x128xf32>
    %6 = tpu.matmul %4, %5, %cst {dimension_numbers = #tpu.dot_dimension_numbers<[1], [0], [0], [1], [0, 0, 1, 1], [], []>} : vector<16x32xbf16>, vector<32x128xbf16>, vector<16x128xf32> -> vector<16x128xf32>
    %7 = arith.addf %3, %6 : vector<16x128xf32>
    %c0_6 = arith.constant 0 : index
    %c0_7 = arith.constant 0 : index
    %8 = vector.load %arg7[%c0_6, %c0_7] : memref<16x128xf32, #tpu.memory_space<vmem>>, vector<16x128xf32>
    tpu.vector_store %arg7[%c0_6, %c0_7], %7 {strides = array<i32>} : memref<16x128xf32, #tpu.memory_space<vmem>>, vector<16x128xf32>,
    %c0_i32_8 = arith.constant 0 : i32
    %9 = arith.cmpi eq, %arg2, %c0_i32_8 : i32
    %10 = arith.extui %9 : i1 to i32
    %c0_i32_9 = arith.constant 0 : i32
    %11 = arith.cmpi ne, %10, %c0_i32_9 : i32
    scf.if %11 {
      %c0_10 = arith.constant 0 : index
      %c0_11 = arith.constant 0 : index
      %12 = vector.load %arg7[%c0_10, %c0_11] : memref<16x128xf32, #tpu.memory_space<vmem>>, vector<16x128xf32>
      %c0_12 = arith.constant 0 : index
      %c0_13 = arith.constant 0 : index
      %13 = vector.load %arg5[%c0_12, %c0_13] : memref<1x128xf32, #tpu.memory_space<vmem>>, vector<1x128xf32>
      %14 = vector.broadcast %13 : vector<1x128xf32> to vector<16x128xf32>
      %15 = arith.addf %12, %14 : vector<16x128xf32>
      %c0_14 = arith.constant 0 : index
      %c0_15 = arith.constant 0 : index
      %16 = vector.load %arg6[%c0_14, %c0_15] : memref<16x128xf32, #tpu.memory_space<vmem>>, vector<16x128xf32>
      tpu.vector_store %arg6[%c0_14, %c0_15], %15 {strides = array<i32>} : memref<16x128xf32, #tpu.memory_space<vmem>>, vector<16x128xf32>,
    } else {
    }
    return
  }
  func.func @transform_0(%arg0: i32, %arg1: i32, %arg2: i32) -> (i32, i32) {
    %c0_i32 = arith.constant 0 : i32
    return %arg0, %arg2 : i32, i32
  }
  func.func @transform_1(%arg0: i32, %arg1: i32, %arg2: i32) -> (i32, i32) {
    %c0_i32 = arith.constant 0 : i32
    return %arg2, %arg1 : i32, i32
  }
  func.func @transform_2(%arg0: i32, %arg1: i32, %arg2: i32) -> (i32, i32) {
    %c0_i32 = arith.constant 0 : i32
    %c0_i32_0 = arith.constant 0 : i32
    return %c0_i32, %arg1 : i32, i32
  }
  func.func @transform_3(%arg0: i32, %arg1: i32, %arg2: i32) -> (i32, i32) {
    %c0_i32 = arith.constant 0 : i32
    return %arg0, %arg1 : i32, i32
  }
}

</mosaic_0001>

<bundles_post_ra>
// kernel: transformer_forward.21
= control target key start
LH: loop header
LB: loop body
LE: loop exit
PB: predicated region body
PF: predicated region fallthrough
CT: control target
= control target key end

     0   :  { %vm46_vm0 = vcmask 261120   ;;  %s140_s1 = inlined_call_operand.vmem [shape: bf16[32,128], index: 1, kind: input, shape index: {}]   ;;  %s141_s2 = inlined_call_operand.vmem [shape: f32[1,128], index: 2, kind: input, shape index: {}]   ;;  %s142_s0 = inlined_call_operand.vmem [shape: bf16[16,32], index: 0, kind: input, shape index: {}]   ;;  %s143_s3 = inlined_call_operand.vmem [shape: f32[16,128], index: 3, kind: output, shape index: {}]  }
   0x1   :  { %v100_v0 = vld [vmem:[%s140_s1 + $0x8] sm:$0xff]  ;;  %v99_v1 = vld [vmem:[%s140_s1] sm:$0xff] }
   0x2   :  { %56 = vmatpush.bf16.msra.mxu0 %v100_v0  ;;  %v98_v2 = vld [vmem:[%s142_s0] sm:$0xff] }
   0x3   :  { %v101_v3 = vld [vmem:[%s141_s2] ss:$0 sm:$0xff] }
   0x6   :  { %57 = vmatpush.bf16.msra.mxu0 %v99_v1 }
   0x9   :  { %97 = vmatmul.msk.bf16.vlgmr.msra.gmra.mxu0 %vm46_vm0, %v98_v2 }
  0x86   :  { %v59_v4 = vpop.f32.mrf.mxu0 }
  0x87   :  { %v77_v5 = vadd.f32 %v101_v3, %v59_v4 }
  0x89   :  { %79 = vst [vmem:[%s143_s3] sm:$0xff] %v77_v5 }
  0x8e   :  { %v61_v6 = vpop.f32.mrf.mxu0 }
  0x8f   :  { %v78_v7 = vadd.f32 %v101_v3, %v61_v6 }
  0x91   :  { %80 = vst [vmem:[%s143_s3 + $0x8] sm:$0xff] %v78_v7 }

// kernel: transformer_forward.12
= control target key start
LH: loop header
LB: loop body
LE: loop exit
PB: predicated region body
PF: predicated region fallthrough
CT: control target
= control target key end

     0   :  { %vm50_vm0 = vcmask 261120   ;;  %vm107_vm1 = vcmask 523264   ;;  %v239_v26 = vmov 32.0   ;;  %s329_s1 = inlined_call_operand.vmem [shape: bf16[32,64], index: 1, kind: input, shape index: {}]   ;;  %s330_s0 = inlined_call_operand.vmem [shape: f32[16,32], index: 0, kind: input, shape index: {}]   ;;  %s331_s2 = inlined_call_operand.vmem [shape: f32[1,64], index: 2, kind: input, shape index: {}]   ;;  %s332_s4 = inlined_call_operand.vmem [shape: f32[1,32], index: 4, kind: input, shape index: {}]   ;;  %s333_s3 = inlined_call_operand.vmem [shape: bf16[64,32], index: 3, kind: input, shape index: {}]   ;;  %s334_s5 = inlined_call_operand.vmem [shape: f32[1,32], index: 5, kind: input, shape index: {}]   ;;  %s335_s6 = inlined_call_operand.vmem [shape: f32[1,32], index: 6, kind: input, shape index: {}]   ;;  %s336_s7 = inlined_call_operand.vmem [shape: f32[16,32], index: 7, kind: output, shape index: {}]  }
   0x1   :  { %v223_v0 = vld [vmem:[%s329_s1 + $0x8] sm:$0xff]  ;;  %v222_v1 = vld [vmem:[%s329_s1] sm:$0xff]  ;;  %v227_v5 = vld [vmem:[%s333_s3 + $0x18] sm:$0xff]  ;;  %233 = vrcp.f32 %v239_v26 }
   0x2   :  { %60 = vmatpush.bf16.msra.mxu0 %v223_v0  ;;  %v27_v2 = vld [vmem:[%s330_s0] sm:$0xff]  ;;  %v28_v3 = vld [vmem:[%s330_s0 + $0x8] sm:$0xff]  ;;  %115 = vmatpush.bf16.msra.mxu1 %v227_v5  ;;  %v226_v6 = vld [vmem:[%s333_s3 + $0x10] sm:$0xff] }
   0x3   :  { %v29_v4 = vpack.c.bf16 %v28_v3, %v27_v2  ;;  %v225_v7 = vld [vmem:[%s333_s3 + $0x8] sm:$0xff]  ;;  %v224_v8 = vld [vmem:[%s333_s3] sm:$0xff] }
   0x4   :  { %v229_v10 = vld [vmem:[%s331_s2] ss:$0 sm:$0xff] }
   0x5   :  { %v230_v17 = vld [vmem:[%s332_s4] ss:$0 sm:$0xff] }
   0x6   :  { %61 = vmatpush.bf16.msra.mxu0 %v222_v1  ;;  %116 = vmatpush.bf16.msra.mxu1 %v226_v6  ;;  %v231_v57 = vld [vmem:[%s334_s5] ss:$0 sm:$0xff] }
   0x7   :  { %v234_v27 = vpop.eup %233  ;;  %v232_v60 = vld [vmem:[%s335_s6] ss:$0 sm:$0xff] }
   0x8   :  { %v134_v28 = vmul.f32 32.0, %v234_v27  ;;  %vm138_vm2 = vweird.f32 %v234_v27 }
   0x9   :  { %204 = vmatmul.msk.bf16.vlgmr.msra.gmra.mxu0 %vm50_vm0, %v29_v4 }
   0xa   :  { %117 = vmatpush.bf16.msra.mxu1 %v225_v7  ;;  %v135_v29 = vsub.f32 1.0, %v134_v28 }
   0xc   :  { %v136_v30 = vmul.f32 %v234_v27, %v135_v29 }
   0xe   :  { %118 = vmatpush.bf16.msra.mxu1 %v224_v8  ;;  %v137_v31 = vadd.f32 %v234_v27, %v136_v30 }
  0x10   :  { %v139_v32 = vsel %vm138_vm2, %v234_v27, %v137_v31 }
  0x86   :  { %v63_v9 = vpop.f32.mrf.mxu0 }
  0x87   :  { %v64_v11 = vadd.f32 %v229_v10, %v63_v9 }
  0x89   :  { %v68_v14 = vmax.f32 %v64_v11, 0.0 }
  0x8e   :  { %v65_v12 = vpop.f32.mrf.mxu0 }
  0x8f   :  { %v66_v13 = vadd.f32 %v229_v10, %v65_v12 }
  0x91   :  { %v69_v15 = vmax.f32 %v66_v13, 0.0 }
  0x93   :  { %v70_v16 = vpack.c.bf16 %v69_v15, %v68_v14 }
  0x95   :  { %221 = vmatmul.msk.bf16.vlgmr.msra.gmra.mxu1 %vm107_vm1, %v70_v16 }
 0x112   :  { %v120_v18 = vpop.f32.mrf.mxu1 }
 0x113   :  { %v121_v19 = vadd.f32 %v230_v17, %v120_v18 }
 0x115   :  { %v125_v20 = vadd.f32 %v121_v19, %v27_v2 }
 0x117   :  { %v127_v21 = vsel %vm50_vm0, %v125_v20, 0.0 }
 0x118   :  { %128 = vadd.xlane.f32.xlu0 %v127_v21 }
 0x11a   :  { %v122_v22 = vpop.f32.mrf.mxu1 }
 0x11b   :  { %v123_v23 = vadd.f32 %v230_v17, %v122_v22 }
 0x11d   :  { %v126_v24 = vadd.f32 %v123_v23, %v28_v3 }
 0x11f   :  { %v130_v25 = vsel %vm50_vm0, %v126_v24, 0.0 }
 0x120   :  { %131 = vadd.xlane.f32.xlu0 %v130_v25 }
 0x18b   :  { %v129_v33 = vpop.xlane.xlu0 %128 }
 0x18c   :  { %v140_v34 = vmul.f32 %v139_v32, %v129_v33 }
 0x18e   :  { %v142_v35 = vsub.f32 %v125_v20, %v140_v34 }
 0x190   :  { %v144_v36 = vmul.f32 %v142_v35, %v142_v35 }
 0x192   :  { %v146_v37 = vsel %vm50_vm0, %v144_v36, 0.0 }
 0x193   :  { %147 = vadd.xlane.f32.xlu1 %v146_v37  ;;  %v132_v38 = vpop.xlane.xlu0 %131 }
 0x194   :  { %v141_v39 = vmul.f32 %v139_v32, %v132_v38 }
 0x196   :  { %v143_v40 = vsub.f32 %v126_v24, %v141_v39 }
 0x198   :  { %v145_v41 = vmul.f32 %v143_v40, %v143_v40 }
 0x19a   :  { %v149_v42 = vsel %vm50_vm0, %v145_v41, 0.0 }
 0x19b   :  { %150 = vadd.xlane.f32.xlu1 %v149_v42 }
 0x206   :  { %v148_v43 = vpop.xlane.xlu1 %147 }
 0x207   :  { %v152_v44 = vmul.f32 %v148_v43, %v139_v32 }
 0x209   :  { %v154_v45 = vadd.f32 1e-05, %v152_v44 }
 0x20b   :  { %235 = vrsqrt.f32 %v154_v45  ;;  %vm162_vm4 = vweird.f32 %v154_v45 }
 0x20e   :  { %v151_v46 = vpop.xlane.xlu1 %150 }
 0x20f   :  { %v153_v47 = vmul.f32 %v151_v46, %v139_v32 }
 0x211   :  { %v236_v48 = vpop.eup %235  ;;  %v155_v49 = vadd.f32 1e-05, %v153_v47 }
 0x212   :  { %v157_v50 = vmul.f32 %v236_v48, %v154_v45  ;;  %vm163_vm3 = vweird.f32 %v236_v48 }
 0x213   :  { %237 = vrsqrt.f32 %v155_v49  ;;  %vm164_vm5 = vmor %vm162_vm4, %vm163_vm3  ;;  %vm172_vm7 = vweird.f32 %v155_v49 }
 0x214   :  { %v158_v51 = vmul.f32 %v236_v48, %v157_v50 }
 0x216   :  { %v159_v52 = vmul.f32 0.5, %v158_v51 }
 0x218   :  { %v160_v53 = vsub.f32 1.5, %v159_v52 }
 0x219   :  { %v238_v54 = vpop.eup %237 }
 0x21a   :  { %v161_v55 = vmul.f32 %v236_v48, %v160_v53  ;;  %v167_v56 = vmul.f32 %v238_v54, %v155_v49  ;;  %vm173_vm6 = vweird.f32 %v238_v54 }
 0x21b   :  { %vm174_vm8 = vmor %vm172_vm7, %vm173_vm6 }
 0x21c   :  { %v165_v58 = vsel %vm164_vm5, %v236_v48, %v161_v55  ;;  %v168_v59 = vmul.f32 %v238_v54, %v167_v56 }
 0x21d   :  { %v176_v61 = vmul.f32 %v165_v58, %v142_v35 }
 0x21e   :  { %v169_v62 = vmul.f32 0.5, %v168_v59 }
 0x21f   :  { %v182_v63 = vmul.f32 %v231_v57, %v176_v61 }
 0x220   :  { %v170_v0 = vsub.f32 1.5, %v169_v62 }
 0x221   :  { %v188_v1 = vadd.f32 %v232_v60, %v182_v63 }
 0x222   :  { %v171_v2 = vmul.f32 %v238_v54, %v170_v0 }
 0x223   :  { %190 = vst.msk [vmem:[%s336_s7] sm:$0xff] %vm50_vm0, %v188_v1 }
 0x224   :  { %v175_v3 = vsel %vm174_vm8, %v238_v54, %v171_v2 }
 0x225   :  { %v177_v4 = vmul.f32 %v175_v3, %v143_v40 }
 0x227   :  { %v183_v5 = vmul.f32 %v231_v57, %v177_v4 }
 0x229   :  { %v189_v6 = vadd.f32 %v232_v60, %v183_v5 }
 0x22b   :  { %191 = vst.msk [vmem:[%s336_s7 + $0x8] sm:$0xff] %vm50_vm0, %v189_v6 }

// kernel: transformer_forward.11
= control target key start
LH: loop header
LB: loop body
LE: loop exit
PB: predicated region body
PF: predicated region fallthrough
CT: control target
= control target key end

     0   :  { %s1592_s25 = smov 0   ;;  %s1821_s0 = inlined_call_operand.vmem [shape: f32[2,8,32], index: 0, kind: input, shape index: {}, may-alias: {0,1}]   ;;  %s1822_s1 = inlined_call_operand.vmem [shape: f32[2,8,32], index: 1, kind: input, shape index: {}, may-alias: {0,1}]   ;;  %s1823_s2 = inlined_call_operand.vmem [shape: s32[2,1,8], index: 2, kind: input, shape index: {}]   ;;  %s1824_s3 = inlined_call_operand.vmem [shape: bf16[4,32,8], index: 3, kind: input, shape index: {}]   ;;  %s1825_s4 = inlined_call_operand.vmem [shape: bf16[4,32,8], index: 4, kind: input, shape index: {}]   ;;  %s1826_s5 = inlined_call_operand.vmem [shape: bf16[4,32,8], index: 5, kind: input, shape index: {}]   ;;  %s1827_s6 = inlined_call_operand.vmem [shape: f32[4,1,8], index: 6, kind: input, shape index: {}]   ;;  %s1828_s7 = inlined_call_operand.vmem [shape: f32[4,1,8], index: 7, kind: input, shape index: {}]   ;;  %s1829_s8 = inlined_call_operand.vmem [shape: f32[4,1,8], index: 8, kind: input, shape index: {}]   ;;  %s1830_s9 = inlined_call_operand.vmem [shape: bf16[4,8,32], index: 9, kind: input, shape index: {}]   ;;  %s1831_s10 = inlined_call_operand.vmem [shape: f32[1,32], index: 10, kind: input, shape index: {}]   ;;  %s1832_s11 = inlined_call_operand.vmem [shape: f32[1,32], index: 11, kind: input, shape index: {}]   ;;  %s1833_s12 = inlined_call_operand.vmem [shape: f32[1,32], index: 12, kind: input, shape index: {}]   ;;  %s1834_s13 = inlined_call_operand.vmem [shape: f32[2,8,32], index: 13, kind: output, shape index: {}]  }
   0x1 LB: > { %s1313_s26 = sadd.s32 4294967295, %s1518_s25   ;;  %p1317_p0 = scmp.ge.s32.totalorder %s1518_s25, 1  ;;  %s1518_s25 = sphi %s1592_s25, %s23_s25  }
   0x2   : > { %p403_p1 = scmp.lt.s32.totalorder %s1518_s25, 3 }
   0x4   : > { %p404_p2 = pnand %p1317_p0, %p403_p1 }
   0x5   : > { %p452_p3 = scmp.lt.s32.totalorder (!%p404_p2), %s1313_s26, 1 }
   0x6   : > { %407 = sbr.rel (%p404_p2) target bundleno = 1122 (0x462), region = 72 }
   0xb   : > { %v1444_v0 = vld [vmem:[%s1824_s3 + $0x8] sm:$0xff]  ;;  %v1446_v1 = vld [vmem:[%s1824_s3 + $0x18] sm:$0xff]  ;;  %v1443_v4 = vld [vmem:[%s1824_s3] sm:$0xff]  ;;  %s1838_s26 = smov (!%p452_p3, %s1313_s26), 1  ;;  %vm516_vm0 = vcmask 261120   ;;  %vm883_vm1 = vcmask 64512  }
   0xc   : > { %v1448_v2 = vld [vmem:[%s1824_s3 + $0x28] sm:$0xff]  ;;  %v1450_v3 = vld [vmem:[%s1824_s3 + $0x38] sm:$0xff]  ;;  %526 = vmatpush.bf16.msra.mxu0 %v1444_v0  ;;  %551 = vmatpush.bf16.msra.mxu1 %v1446_v1  ;;  %v1445_v5 = vld [vmem:[%s1824_s3 + $0x10] sm:$0xff]  ;;  %s1627_s28 = sshll.u32 %s1838_s26, 3  ;;  %vm1028_vm2 = vcmask 1043456   ;;  %s462_s20 = scalar_lea.vmem %s1823_s2, %s1838_s26 }
   0xd   : > { %576 = vmatpush.bf16.msra.mxu2 %v1448_v2  ;;  %601 = vmatpush.bf16.msra.mxu3 %v1450_v3  ;;  %v1447_v6 = vld [vmem:[%s1824_s3 + $0x20] sm:$0xff]  ;;  %v1449_v7 = vld [vmem:[%s1824_s3 + $0x30] sm:$0xff]  ;;  %v1452_v8 = vld [vmem:[%s1825_s4 + $0x8] sm:$0xff]  ;;  %s455_s18 = scalar_lea.vmem %s1821_s0, %s1627_s28  ;;  %s459_s19 = scalar_lea.vmem %s1822_s1, %s1627_s28 }
   0xe   : > { %v1454_v9 = vld [vmem:[%s1825_s4 + $0x18] sm:$0xff]  ;;  %v1456_v10 = vld [vmem:[%s1825_s4 + $0x28] sm:$0xff]  ;;  %v1645_v12 = vld [vmem:[%s455_s18] sm:$0xff]  ;;  %s466_s21 = scalar_lea.vmem %s1834_s13, %s1627_s28 }
   0xf   : > { %v1458_v11 = vld [vmem:[%s1825_s4 + $0x38] sm:$0xff]  ;;  %v1451_v13 = vld [vmem:[%s1825_s4] sm:$0xff]  ;;  %v1453_v14 = vld [vmem:[%s1825_s4 + $0x10] sm:$0xff]  ;;  %v470_v15 = vpack.c.bf16 %v1645_v12, %v1645_v12 }
  0x10   : > { %527 = vmatpush.bf16.msra.mxu0 %v1443_v4  ;;  %552 = vmatpush.bf16.msra.mxu1 %v1445_v5  ;;  %v1455_v16 = vld [vmem:[%s1825_s4 + $0x20] sm:$0xff]  ;;  %v1457_v17 = vld [vmem:[%s1825_s4 + $0x30] sm:$0xff]  ;;  %v1464_v20 = vld [vmem:[%s1826_s5 + $0x28] sm:$0xff] }
  0x11   : > { %577 = vmatpush.bf16.msra.mxu2 %v1447_v6  ;;  %602 = vmatpush.bf16.msra.mxu3 %v1449_v7  ;;  %v469_v18 = vld [vmem:[%s459_s19] sm:$0xff]  ;;  %v1460_v21 = vld [vmem:[%s1826_s5 + $0x8] sm:$0xff]  ;;  %v1462_v22 = vld [vmem:[%s1826_s5 + $0x18] sm:$0xff] }
  0x12   : > { %v471_v19 = vpack.c.bf16 %v469_v18, %v469_v18  ;;  %v1463_v23 = vld [vmem:[%s1826_s5 + $0x20] sm:$0xff]  ;;  %v1461_v25 = vld [vmem:[%s1826_s5 + $0x10] sm:$0xff]  ;;  %v1466_v26 = vld [vmem:[%s1826_s5 + $0x38] sm:$0xff] }
  0x13   : > { %1329 = vmatmul.msk.bf16.vlgmr.msra.gmra.mxu0 %vm516_vm0, %v470_v15  ;;  %1338 = vmatmul.msk.bf16.vlgmr.msra.gmra.mxu1 %vm516_vm0, %v470_v15  ;;  %v1459_v24 = vld [vmem:[%s1826_s5] sm:$0xff]  ;;  %v1465_v27 = vld [vmem:[%s1826_s5 + $0x30] sm:$0xff] }
  0x14   : > { %661 = vmatpush.bf16.msrb.mxu0 %v1452_v8  ;;  %686 = vmatpush.bf16.msrb.mxu1 %v1454_v9  ;;  %v1481_v34 = vld [vmem:[%s1828_s7] ss:$0 sm:$0xff]  ;;  %v1482_v35 = vld [vmem:[%s1828_s7 + $0x1] ss:$0 sm:$0xff]  ;;  %v1483_v46 = vld [vmem:[%s1828_s7 + $0x2] ss:$0 sm:$0xff] }
  0x15   : > { %1347 = vmatmul.msk.bf16.vlgmr.msra.gmra.mxu2 %vm516_vm0, %v470_v15  ;;  %1356 = vmatmul.msk.bf16.vlgmr.msra.gmra.mxu3 %vm516_vm0, %v470_v15  ;;  %v1478_v42 = vld [vmem:[%s1827_s6 + $0x1] ss:$0 sm:$0xff]  ;;  %v1477_v45 = vld [vmem:[%s1827_s6] ss:$0 sm:$0xff]  ;;  %v1484_v47 = vld [vmem:[%s1828_s7 + $0x3] ss:$0 sm:$0xff] }
  0x16   : > { %711 = vmatpush.bf16.msrb.mxu2 %v1456_v10  ;;  %736 = vmatpush.bf16.msrb.mxu3 %v1458_v11  ;;  %v1479_v59 = vld [vmem:[%s1827_s6 + $0x2] ss:$0 sm:$0xff]  ;;  %v1480_v60 = vld [vmem:[%s1827_s6 + $0x3] ss:$0 sm:$0xff]  ;;  %v1485_v8 = vld [vmem:[%s1829_s8] ss:$0 sm:$0xff] }
  0x17   : > { %v1486_v9 = vld [vmem:[%s1829_s8 + $0x1] ss:$0 sm:$0xff]  ;;  %v1487_v15 = vld [vmem:[%s1829_s8 + $0x2] ss:$0 sm:$0xff] }
  0x18   : > { %662 = vmatpush.bf16.msrb.mxu0 %v1451_v13  ;;  %687 = vmatpush.bf16.msrb.mxu1 %v1453_v14 }
  0x1a   : > { %712 = vmatpush.bf16.msrb.mxu2 %v1455_v16  ;;  %737 = vmatpush.bf16.msrb.mxu3 %v1457_v17 }
  0x1c   : > { %793 = vmatpush.bf16.msra.mxu0 %v1460_v21  ;;  %818 = vmatpush.bf16.msra.mxu1 %v1462_v22 }
  0x1e   : > { %843 = vmatpush.bf16.msra.mxu2 %v1464_v20  ;;  %868 = vmatpush.bf16.msra.mxu3 %v1466_v26  ;;  %v1488_v26 = vld [vmem:[%s1829_s8 + $0x3] ss:$0 sm:$0xff] }
  0x20   : > { %794 = vmatpush.bf16.msra.mxu0 %v1459_v24  ;;  %819 = vmatpush.bf16.msra.mxu1 %v1461_v25 }
  0x22   : > { %844 = vmatpush.bf16.msra.mxu2 %v1463_v23  ;;  %869 = vmatpush.bf16.msra.mxu3 %v1465_v27 }
  0x23   : > { %1365 = vmatmul.msk.bf16.vlgmr.msrb.gmra.mxu0 %vm516_vm0, %v471_v19  ;;  %1374 = vmatmul.msk.bf16.vlgmr.msrb.gmra.mxu1 %vm516_vm0, %v471_v19 }
  0x25   : > { %1383 = vmatmul.msk.bf16.vlgmr.msrb.gmra.mxu2 %vm516_vm0, %v471_v19  ;;  %1392 = vmatmul.msk.bf16.vlgmr.msrb.gmra.mxu3 %vm516_vm0, %v471_v19 }
  0x33   : > { %1401 = vmatmul.msk.bf16.vlgmr.msra.gmra.mxu0 %vm516_vm0, %v471_v19  ;;  %1410 = vmatmul.msk.bf16.vlgmr.msra.gmra.mxu1 %vm516_vm0, %v471_v19 }
  0x35   : > { %1419 = vmatmul.msk.bf16.vlgmr.msra.gmra.mxu2 %vm516_vm0, %v471_v19  ;;  %1428 = vmatmul.msk.bf16.vlgmr.msra.gmra.mxu3 %vm516_vm0, %v471_v19 }
  0x90   : > { %v529_v28 = vpop.f32.mrf.mxu0  ;;  %v554_v29 = vpop.f32.mrf.mxu1 }
  0x91   : > { %v555_v50 = vadd.f32 %v1478_v42, %v554_v29  ;;  %v530_v53 = vadd.f32 %v1477_v45, %v529_v28 }
  0x93   : > { %v876_v58 = vpack.c.bf16 %v555_v50, %v555_v50  ;;  %v875_v63 = vpack.c.bf16 %v530_v53, %v530_v53 }
  0x98   : > { %v579_v30 = vpop.f32.mrf.mxu2  ;;  %v604_v31 = vpop.f32.mrf.mxu3 }
  0x99   : > { %v531_v32 = vpop.f32.mrf.mxu0  ;;  %v556_v33 = vpop.f32.mrf.mxu1  ;;  %v580_v2 = vadd.f32 %v1479_v59, %v579_v30  ;;  %v605_v3 = vadd.f32 %v1480_v60, %v604_v31 }
  0x9a   : > { %v964_v33 = vld [vmem:[%s462_s20] sm:$0x1] }
  0x9b   : > { %v877_v6 = vpack.c.bf16 %v580_v2, %v580_v2  ;;  %v878_v7 = vpack.c.bf16 %v605_v3, %v605_v3  ;;  %vm965_vm3 = vcmp.eq.s32.totalorder %v964_v33, 0  ;;  %v1107_v33 = vld [vmem:[%s1830_s9 + $0x4] sm:$0xf] }
  0xa0   : > { %v581_v36 = vpop.f32.mrf.mxu2  ;;  %v606_v37 = vpop.f32.mrf.mxu3 }
  0xa1   : > { %v664_v38 = vpop.f32.mrf.mxu0  ;;  %v689_v39 = vpop.f32.mrf.mxu1 }
  0xa2   : > { %v665_v40 = vadd.f32 %v1481_v34, %v664_v38  ;;  %v690_v41 = vadd.f32 %v1482_v35, %v689_v39  ;;  %v1520_v34 = vmov 0  }
  0xa3   : > { %v966_v35 = vsel %vm965_vm3, 1, %v1520_v34  ;;  %v1133_v34 = vsel %vm1028_vm2, %v1107_v33, 0 }
  0xa4   : > { %v879_v43 = vpack.c.bf16 %v665_v40, %v665_v40  ;;  %v880_v44 = vpack.c.bf16 %v690_v41, %v690_v41  ;;  %v967_v36 = vperm.slane %v966_v35, 0  ;;  %v1108_v35 = vld [vmem:[%s1830_s9 + $0x8] sm:$0xf] }
  0xa6   : > { %v888_v48 = vsel %vm883_vm1, %v879_v43, 0  ;;  %v907_v49 = vsel %vm883_vm1, %v880_v44, 0  ;;  %vm1753_vm4 = vcmp.eq.s32.totalorder %v967_v36, 1  ;;  %v1152_v36 = vsel %vm1028_vm2, %v1108_v35, 0 }
  0xa7   : > { %897 = vmatpush.bf16.xpose.msrb.mxu0 %v888_v48  ;;  %916 = vmatpush.bf16.xpose.msrb.mxu1 %v907_v49 }
  0xa8   : > { %v714_v51 = vpop.f32.mrf.mxu2  ;;  %v739_v52 = vpop.f32.mrf.mxu3 }
  0xa9   : > { %v715_v54 = vadd.f32 %v1483_v46, %v714_v51  ;;  %v740_v55 = vadd.f32 %v1484_v47, %v739_v52  ;;  %v666_v56 = vpop.f32.mrf.mxu0  ;;  %v691_v57 = vpop.f32.mrf.mxu1 }
  0xab   : > { %v881_v61 = vpack.c.bf16 %v715_v54, %v715_v54  ;;  %v882_v62 = vpack.c.bf16 %v740_v55, %v740_v55 }
  0xad   : > { %v926_v0 = vsel %vm883_vm1, %v881_v61, 0  ;;  %v945_v1 = vsel %vm883_vm1, %v882_v62, 0 }
  0xae   : > { %935 = vmatpush.bf16.xpose.msrb.mxu2 %v926_v0  ;;  %954 = vmatpush.bf16.xpose.msrb.mxu3 %v945_v1 }
  0xaf   : > { %1429 = vmatmul.msk.bf16.vlgmr.msrb.gmra.mxu0 %vm883_vm1, %v875_v63  ;;  %1430 = vmatmul.msk.bf16.vlgmr.msrb.gmra.mxu1 %vm883_vm1, %v876_v58 }
  0xb0   : > { %v716_v4 = vpop.f32.mrf.mxu2  ;;  %v741_v5 = vpop.f32.mrf.mxu3 }
  0xb1   : > { %v796_v10 = vpop.f32.mrf.mxu0  ;;  %v821_v11 = vpop.f32.mrf.mxu1 }
  0xb2   : > { %v797_v13 = vadd.f32 %v1485_v8, %v796_v10  ;;  %v822_v14 = vadd.f32 %v1486_v9, %v821_v11 }
  0xb4   : > { %v1021_v16 = vpack.c.bf16 %v797_v13, %v797_v13  ;;  %v1022_v17 = vpack.c.bf16 %v822_v14, %v822_v14 }
  0xb5   : > { %1431 = vmatmul.msk.bf16.vlgmr.msrb.gmra.mxu2 %vm883_vm1, %v877_v6  ;;  %1432 = vmatmul.msk.bf16.vlgmr.msrb.gmra.mxu3 %vm883_vm1, %v878_v7 }
  0xb6   : > { %v1030_v19 = vsel %vm1028_vm2, %v1021_v16, 0  ;;  %v1049_v20 = vsel %vm1028_vm2, %v1022_v17, 0 }
  0xb7   : > { %1039 = vmatpush.bf16.msra.mxu0 %v1030_v19  ;;  %1058 = vmatpush.bf16.msra.mxu1 %v1049_v20 }
  0xb8   : > { %v846_v18 = vpop.f32.mrf.mxu2  ;;  %v871_v27 = vpop.f32.mrf.mxu3 }
  0xb9   : > { %v847_v21 = vadd.f32 %v1487_v15, %v846_v18  ;;  %v798_v23 = vpop.f32.mrf.mxu0  ;;  %v823_v24 = vpop.f32.mrf.mxu1  ;;  %v872_v29 = vadd.f32 %v1488_v26, %v871_v27 }
  0xbb   : > { %v1023_v22 = vpack.c.bf16 %v847_v21, %v847_v21  ;;  %v1024_v30 = vpack.c.bf16 %v872_v29, %v872_v29  ;;  %1142 = vmatpush.bf16.msrb.mxu1 %v1133_v34 }
  0xbd   : > { %v1068_v25 = vsel %vm1028_vm2, %v1023_v22, 0  ;;  %v1087_v31 = vsel %vm1028_vm2, %v1024_v30, 0 }
  0xbe   : > { %1077 = vmatpush.bf16.msra.mxu2 %v1068_v25  ;;  %1096 = vmatpush.bf16.msra.mxu3 %v1087_v31  ;;  %v1106_v31 = vld [vmem:[%s1830_s9] sm:$0xf] }
  0xc0   : > { %v848_v28 = vpop.f32.mrf.mxu2  ;;  %v873_v32 = vpop.f32.mrf.mxu3 }
  0xc1   : > { %v1114_v32 = vsel %vm1028_vm2, %v1106_v31, 0 }
  0xc2   : > { %1123 = vmatpush.bf16.msrb.mxu0 %v1114_v32  ;;  %1161 = vmatpush.bf16.msrb.mxu2 %v1152_v36 }
 0x12c   : > { %v899_v37 = vpop.f32.mrf.mxu0  ;;  %v918_v38 = vpop.f32.mrf.mxu1 }
 0x12d   : > { %v960_v40 = vmul.f32 0.35355338, %v899_v37  ;;  %v961_v43 = vmul.f32 0.35355338, %v918_v38  ;;  %v1109_v37 = vld [vmem:[%s1830_s9 + $0xc] sm:$0xf] }
 0x12e   : > { %v1171_v38 = vsel %vm1028_vm2, %v1109_v37, 0 }
 0x12f   : > { %v969_v41 = vsel %vm1753_vm4, -1e+09, %v960_v40  ;;  %v970_v46 = vsel %vm1753_vm4, -1e+09, %v961_v43  ;;  %1180 = vmatpush.bf16.msrb.mxu3 %v1171_v38 }
 0x130   : > { %v973_v42 = vsel %vm883_vm1, %v969_v41, -inf  ;;  %v976_v49 = vsel %vm883_vm1, %v970_v46, -inf }
 0x131   : > { %974 = vmax.xlane.f32.xlu1 %v973_v42 }
 0x134   : > { %v901_v44 = vpop.f32.mrf.mxu0  ;;  %v920_v45 = vpop.f32.mrf.mxu1 }
 0x138   : > { %v937_v47 = vpop.f32.mrf.mxu2  ;;  %v956_v48 = vpop.f32.mrf.mxu3 }
 0x139   : > { %v962_v50 = vmul.f32 0.35355338, %v937_v47  ;;  %977 = vmax.xlane.f32.xlu1 %v976_v49  ;;  %v963_v53 = vmul.f32 0.35355338, %v956_v48 }
 0x13b   : > { %v971_v51 = vsel %vm1753_vm4, -1e+09, %v962_v50  ;;  %v972_v56 = vsel %vm1753_vm4, -1e+09, %v963_v53 }
 0x13c   : > { %v979_v52 = vsel %vm883_vm1, %v971_v51, -inf  ;;  %v982_v57 = vsel %vm883_vm1, %v972_v56, -inf }
 0x13d   : > { %980 = vmax.xlane.f32.xlu0 %v979_v52 }
 0x140   : > { %v939_v54 = vpop.f32.mrf.mxu2  ;;  %v958_v55 = vpop.f32.mrf.mxu3 }
 0x145   : > { %983 = vmax.xlane.f32.xlu0 %v982_v57 }
 0x1a4   : > { %v975_v58 = vpop.xlane.xlu1 %974 }
 0x1a5   : > { %v985_v59 = vsub.f32 %v969_v41, %v975_v58 }
 0x1a7   : > { %v989_v60 = vmul.f32 1.442695, %v985_v59 }
 0x1a9   : > { %1492 = vpow2.f32 %v989_v60 }
 0x1ac   : > { %v978_v61 = vpop.xlane.xlu1 %977 }
 0x1ad   : > { %v986_v62 = vsub.f32 %v970_v46, %v978_v61 }
 0x1af   : > { %v1493_v63 = vpop.eup %1492  ;;  %v991_v0 = vmul.f32 1.442695, %v986_v62 }
 0x1b0   : > { %v981_v1 = vpop.xlane.xlu0 %980  ;;  %v997_v2 = vsel %vm883_vm1, %v1493_v63, 0.0 }
 0x1b1   : > { %1494 = vpow2.f32 %v991_v0  ;;  %v987_v3 = vsub.f32 %v971_v51, %v981_v1  ;;  %998 = vadd.xlane.f32.xlu0 %v997_v2 }
 0x1b3   : > { %v993_v4 = vmul.f32 1.442695, %v987_v3 }
 0x1b5   : > { %1496 = vpow2.f32 %v993_v4 }
 0x1b7   : > { %v1495_v5 = vpop.eup %1494 }
 0x1b8   : > { %v984_v6 = vpop.xlane.xlu0 %983  ;;  %v1000_v7 = vsel %vm883_vm1, %v1495_v5, 0.0 }
 0x1b9   : > { %v988_v8 = vsub.f32 %v972_v56, %v984_v6  ;;  %1001 = vadd.xlane.f32.xlu1 %v1000_v7  ;;  %v1521_v6 = vmov 32.0  }
 0x1bb   : > { %v1497_v9 = vpop.eup %1496  ;;  %v995_v10 = vmul.f32 1.442695, %v988_v8 }
 0x1bc   : > { %v1003_v11 = vsel %vm883_vm1, %v1497_v9, 0.0 }
 0x1bd   : > { %1498 = vpow2.f32 %v995_v10  ;;  %1004 = vadd.xlane.f32.xlu2 %v1003_v11 }
 0x1c3   : > { %v1499_v13 = vpop.eup %1498 }
 0x1c4   : > { %v1006_v14 = vsel %vm883_vm1, %v1499_v13, 0.0 }
 0x1c5   : > { %1007 = vadd.xlane.f32.xlu2 %v1006_v14 }
 0x224   : > { %v999_v15 = vpop.xlane.xlu0 %998 }
 0x225   : > { %1500 = vrcp.f32 %v999_v15 }
 0x22b   : > { %v1501_v16 = vpop.eup %1500 }
 0x22c   : > { %v1013_v17 = vmul.f32 %v1501_v16, %v1493_v63  ;;  %v1002_v18 = vpop.xlane.xlu1 %1001  ;;  %v1489_v63 = vld [vmem:[%s1831_s10] ss:$0 sm:$0xff] }
 0x22d   : > { %1502 = vrcp.f32 %v1002_v18 }
 0x22e   : > { %v1017_v19 = vpack.c.bf16 %v1013_v17, %v1013_v17 }
 0x230   : > { %v1005_v20 = vpop.xlane.xlu2 %1004  ;;  %1433 = vmatmul.msk.bf16.vlgmr.msra.gmra.mxu0 %vm883_vm1, %v1017_v19 }
 0x231   : > { %1504 = vrcp.f32 %v1005_v20 }
 0x233   : > { %v1503_v21 = vpop.eup %1502 }
 0x234   : > { %v1014_v22 = vmul.f32 %v1503_v21, %v1495_v5 }
 0x236   : > { %v1018_v23 = vpack.c.bf16 %v1014_v22, %v1014_v22 }
 0x237   : > { %v1505_v24 = vpop.eup %1504 }
 0x238   : > { %v1015_v25 = vmul.f32 %v1505_v24, %v1497_v9  ;;  %v1008_v26 = vpop.xlane.xlu2 %1007  ;;  %1434 = vmatmul.msk.bf16.vlgmr.msra.gmra.mxu1 %vm883_vm1, %v1018_v23 }
 0x239   : > { %1506 = vrcp.f32 %v1008_v26 }
 0x23a   : > { %v1019_v27 = vpack.c.bf16 %v1015_v25, %v1015_v25  ;;  %1508 = vrcp.f32 %v1521_v6 }
 0x23c   : > { %1435 = vmatmul.msk.bf16.vlgmr.msra.gmra.mxu2 %vm883_vm1, %v1019_v27  ;;  %v1490_v27 = vld [vmem:[%s1832_s11] ss:$0 sm:$0xff] }
 0x23f   : > { %v1507_v28 = vpop.eup %1506 }
 0x240   : > { %v1016_v29 = vmul.f32 %v1507_v28, %v1499_v13  ;;  %v1509_v7 = vpop.eup %1508 }
 0x241   : > { %v1203_v8 = vmul.f32 32.0, %v1509_v7  ;;  %vm1207_vm5 = vweird.f32 %v1509_v7 }
 0x242   : > { %v1020_v30 = vpack.c.bf16 %v1016_v29, %v1016_v29  ;;  %v1491_v29 = vld [vmem:[%s1833_s12] ss:$0 sm:$0xff] }
 0x243   : > { %v1204_v9 = vsub.f32 1.0, %v1203_v8 }
 0x244   : > { %1436 = vmatmul.msk.bf16.vlgmr.msra.gmra.mxu3 %vm883_vm1, %v1020_v30 }
 0x245   : > { %v1205_v10 = vmul.f32 %v1509_v7, %v1204_v9 }
 0x247   : > { %v1206_v11 = vadd.f32 %v1509_v7, %v1205_v10 }
 0x249   : > { %v1208_v13 = vsel %vm1207_vm5, %v1509_v7, %v1206_v11 }
 0x2ad   : > { %v1041_v39 = vpop.f32.mrf.mxu0 }
 0x2ae   : > { %v1102_v40 = vpack.c.bf16 %v1041_v39, %v1041_v39 }
 0x2b0   : > { %1437 = vmatmul.msk.bf16.vlgmr.msrb.gmra.mxu0 %vm883_vm1, %v1102_v40 }
 0x2b5   : > { %v1043_v41 = vpop.f32.mrf.mxu0  ;;  %v1060_v42 = vpop.f32.mrf.mxu1 }
 0x2b6   : > { %v1103_v43 = vpack.c.bf16 %v1060_v42, %v1060_v42 }
 0x2b8   : > { %1438 = vmatmul.msk.bf16.vlgmr.msrb.gmra.mxu1 %vm883_vm1, %v1103_v43 }
 0x2bd   : > { %v1062_v44 = vpop.f32.mrf.mxu1 }
 0x2bf   : > { %v1079_v45 = vpop.f32.mrf.mxu2 }
 0x2c0   : > { %v1104_v46 = vpack.c.bf16 %v1079_v45, %v1079_v45 }
 0x2c2   : > { %1439 = vmatmul.msk.bf16.vlgmr.msrb.gmra.mxu2 %vm883_vm1, %v1104_v46 }
 0x2c7   : > { %v1081_v47 = vpop.f32.mrf.mxu2  ;;  %v1098_v48 = vpop.f32.mrf.mxu3 }
 0x2c8   : > { %v1105_v49 = vpack.c.bf16 %v1098_v48, %v1098_v48 }
 0x2ca   : > { %1440 = vmatmul.msk.bf16.vlgmr.msrb.gmra.mxu3 %vm883_vm1, %v1105_v49 }
 0x2cf   : > { %v1100_v50 = vpop.f32.mrf.mxu3 }
 0x32d   : > { %v1125_v51 = vpop.f32.mrf.mxu0 }
 0x32e   : > { %v1186_v57 = vsel %vm516_vm0, %v1125_v51, 0.0 }
 0x335   : > { %v1127_v52 = vpop.f32.mrf.mxu0  ;;  %v1144_v53 = vpop.f32.mrf.mxu1 }
 0x336   : > { %v1187_v56 = vsel %vm516_vm0, %v1144_v53, 0.0 }
 0x337   : > { %v1188_v59 = vadd.f32 %v1187_v56, %v1186_v57 }
 0x33d   : > { %v1146_v54 = vpop.f32.mrf.mxu1 }
 0x345   : > { %v1163_v55 = vpop.f32.mrf.mxu2 }
 0x346   : > { %v1189_v58 = vsel %vm516_vm0, %v1163_v55, 0.0 }
 0x347   : > { %v1190_v60 = vadd.f32 %v1189_v58, %v1188_v59 }
 0x34d   : > { %v1165_v61 = vpop.f32.mrf.mxu2  ;;  %v1182_v62 = vpop.f32.mrf.mxu3 }
 0x34e   : > { %v1191_v0 = vsel %vm516_vm0, %v1182_v62, 0.0 }
 0x34f   : > { %v1192_v1 = vadd.f32 %v1191_v0, %v1190_v60 }
 0x351   : > { %v1197_v2 = vadd.f32 %v1489_v63, %v1192_v1 }
 0x353   : > { %v1198_v3 = vadd.f32 %v1197_v2, %v1645_v12 }
 0x355   : > { %v1184_v4 = vpop.f32.mrf.mxu3  ;;  %v1199_v5 = vsel %vm516_vm0, %v1198_v3, 0.0 }
 0x356   : > { %1200 = vadd.xlane.f32.xlu2 %v1199_v5 }
 0x3c9   : > { %v1201_v14 = vpop.xlane.xlu2 %1200 }
 0x3ca   : > { %v1209_v15 = vmul.f32 %v1208_v13, %v1201_v14 }
 0x3cc   : > { %v1210_v16 = vsub.f32 %v1198_v3, %v1209_v15 }
 0x3ce   : > { %v1211_v17 = vmul.f32 %v1210_v16, %v1210_v16 }
 0x3d0   : > { %v1212_v18 = vsel %vm516_vm0, %v1211_v17, 0.0 }
 0x3d1   : > { %1213 = vadd.xlane.f32.xlu0 %v1212_v18 }
 0x444   : > { %v1214_v12 = vpop.xlane.xlu0 %1213 }
 0x445   : > { %v1215_v19 = vmul.f32 %v1214_v12, %v1208_v13 }
 0x447   : > { %v1216_v20 = vadd.f32 1e-05, %v1215_v19 }
 0x449   : > { %1510 = vrsqrt.f32 %v1216_v20  ;;  %vm1223_vm7 = vweird.f32 %v1216_v20 }
 0x44f   : > { %v1511_v21 = vpop.eup %1510 }
 0x450   : > { %v1218_v22 = vmul.f32 %v1511_v21, %v1216_v20  ;;  %vm1224_vm6 = vweird.f32 %v1511_v21 }
 0x451   : > { %vm1225_vm8 = vmor %vm1223_vm7, %vm1224_vm6 }
 0x452   : > { %v1219_v23 = vmul.f32 %v1511_v21, %v1218_v22 }
 0x454   : > { %v1220_v24 = vmul.f32 0.5, %v1219_v23 }
 0x456   : > { %v1221_v25 = vsub.f32 1.5, %v1220_v24 }
 0x458   : > { %v1222_v26 = vmul.f32 %v1511_v21, %v1221_v25 }
 0x45a   : > { %v1226_v28 = vsel %vm1225_vm8, %v1511_v21, %v1222_v26 }
 0x45b   : > { %v1227_v30 = vmul.f32 %v1226_v28, %v1210_v16 }
 0x45d   : > { %v1232_v31 = vmul.f32 %v1490_v27, %v1227_v30 }
 0x45f   : > { %v1237_v32 = vadd.f32 %v1491_v29, %v1232_v31 }
 0x461   : > { %1238 = vst.msk [vmem:[%s466_s21] sm:$0xff] %vm516_vm0, %v1237_v32 }
 0x462 PF: > { %s23_s25 = sadd.s32 1, %s1518_s25  }
 0x463   : > { %p20_p4 = scmp.ge.s32.totalorder %s23_s25, 4  }
 0x465   :  { %22 = sbr.rel (!%p20_p4) target bundleno = 1 (0x1), region = 108 }

// kernel: transformer_forward.15
= control target key start
LH: loop header
LB: loop body
LE: loop exit
PB: predicated region body
PF: predicated region fallthrough
CT: control target
= control target key end

     0   :  { %s1596_s25 = smov 0   ;;  %s1814_s0 = inlined_call_operand.vmem [shape: f32[2,8,32], index: 0, kind: input, shape index: {}, may-alias: {0,1}]   ;;  %s1815_s1 = inlined_call_operand.vmem [shape: f32[2,8,32], index: 1, kind: input, shape index: {}, may-alias: {0,1}]   ;;  %s1816_s2 = inlined_call_operand.vmem [shape: s32[2,8,8], index: 2, kind: input, shape index: {}]   ;;  %s1817_s3 = inlined_call_operand.vmem [shape: bf16[4,32,8], index: 3, kind: input, shape index: {}]   ;;  %s1818_s4 = inlined_call_operand.vmem [shape: bf16[4,32,8], index: 4, kind: input, shape index: {}]   ;;  %s1819_s5 = inlined_call_operand.vmem [shape: bf16[4,32,8], index: 5, kind: input, shape index: {}]   ;;  %s1820_s6 = inlined_call_operand.vmem [shape: f32[4,1,8], index: 6, kind: input, shape index: {}]   ;;  %s1821_s7 = inlined_call_operand.vmem [shape: f32[4,1,8], index: 7, kind: input, shape index: {}]   ;;  %s1822_s8 = inlined_call_operand.vmem [shape: f32[4,1,8], index: 8, kind: input, shape index: {}]   ;;  %s1823_s9 = inlined_call_operand.vmem [shape: bf16[4,8,32], index: 9, kind: input, shape index: {}]   ;;  %s1824_s10 = inlined_call_operand.vmem [shape: f32[1,32], index: 10, kind: input, shape index: {}]   ;;  %s1825_s11 = inlined_call_operand.vmem [shape: f32[1,32], index: 11, kind: input, shape index: {}]   ;;  %s1826_s12 = inlined_call_operand.vmem [shape: f32[1,32], index: 12, kind: input, shape index: {}]   ;;  %s1827_s13 = inlined_call_operand.vmem [shape: f32[2,8,32], index: 13, kind: output, shape index: {}]  }
   0x1 LB: > { %s1318_s26 = sadd.s32 4294967295, %s1523_s25   ;;  %p1322_p0 = scmp.ge.s32.totalorder %s1523_s25, 1  ;;  %s1523_s25 = sphi %s1596_s25, %s23_s25  }
   0x2   : > { %p404_p1 = scmp.lt.s32.totalorder %s1523_s25, 3 }
   0x4   : > { %p405_p2 = pnand %p1322_p0, %p404_p1 }
   0x5   : > { %p454_p3 = scmp.lt.s32.totalorder (!%p405_p2), %s1318_s26, 1 }
   0x6   : > { %408 = sbr.rel (%p405_p2) target bundleno = 1122 (0x462), region = 72 }
   0xb   : > { %v1450_v0 = vld [vmem:[%s1817_s3 + $0x8] sm:$0xff]  ;;  %v1452_v1 = vld [vmem:[%s1817_s3 + $0x18] sm:$0xff]  ;;  %v1449_v4 = vld [vmem:[%s1817_s3] sm:$0xff]  ;;  %s1829_s26 = smov (!%p454_p3, %s1318_s26), 1  ;;  %vm519_vm0 = vcmask 261120   ;;  %vm886_vm1 = vcmask 64512  }
   0xc   : > { %v1454_v2 = vld [vmem:[%s1817_s3 + $0x28] sm:$0xff]  ;;  %v1456_v3 = vld [vmem:[%s1817_s3 + $0x38] sm:$0xff]  ;;  %529 = vmatpush.bf16.msra.mxu0 %v1450_v0  ;;  %554 = vmatpush.bf16.msra.mxu1 %v1452_v1  ;;  %v1451_v5 = vld [vmem:[%s1817_s3 + $0x10] sm:$0xff]  ;;  %s1628_s28 = sshll.u32 %s1829_s26, 3  ;;  %vm1030_vm2 = vcmask 1043456  }
   0xd   : > { %579 = vmatpush.bf16.msra.mxu2 %v1454_v2  ;;  %604 = vmatpush.bf16.msra.mxu3 %v1456_v3  ;;  %v1453_v6 = vld [vmem:[%s1817_s3 + $0x20] sm:$0xff]  ;;  %v1455_v7 = vld [vmem:[%s1817_s3 + $0x30] sm:$0xff]  ;;  %v1458_v8 = vld [vmem:[%s1818_s4 + $0x8] sm:$0xff]  ;;  %s457_s18 = scalar_lea.vmem %s1814_s0, %s1628_s28  ;;  %s465_s16 = scalar_lea.vmem %s1816_s2, %s1628_s28 }
   0xe   : > { %v1460_v9 = vld [vmem:[%s1818_s4 + $0x18] sm:$0xff]  ;;  %v1462_v10 = vld [vmem:[%s1818_s4 + $0x28] sm:$0xff]  ;;  %v1646_v12 = vld [vmem:[%s457_s18] sm:$0xff]  ;;  %s461_s18 = scalar_lea.vmem %s1815_s1, %s1628_s28 }
   0xf   : > { %v1464_v11 = vld [vmem:[%s1818_s4 + $0x38] sm:$0xff]  ;;  %v1457_v13 = vld [vmem:[%s1818_s4] sm:$0xff]  ;;  %v1459_v14 = vld [vmem:[%s1818_s4 + $0x10] sm:$0xff]  ;;  %v473_v15 = vpack.c.bf16 %v1646_v12, %v1646_v12 }
  0x10   : > { %530 = vmatpush.bf16.msra.mxu0 %v1449_v4  ;;  %555 = vmatpush.bf16.msra.mxu1 %v1451_v5  ;;  %v1461_v16 = vld [vmem:[%s1818_s4 + $0x20] sm:$0xff]  ;;  %v1463_v17 = vld [vmem:[%s1818_s4 + $0x30] sm:$0xff]  ;;  %v1470_v20 = vld [vmem:[%s1819_s5 + $0x28] sm:$0xff] }
  0x11   : > { %580 = vmatpush.bf16.msra.mxu2 %v1453_v6  ;;  %605 = vmatpush.bf16.msra.mxu3 %v1455_v7  ;;  %v472_v18 = vld [vmem:[%s461_s18] sm:$0xff]  ;;  %v1466_v21 = vld [vmem:[%s1819_s5 + $0x8] sm:$0xff]  ;;  %v1468_v22 = vld [vmem:[%s1819_s5 + $0x18] sm:$0xff]  ;;  %s469_s18 = scalar_lea.vmem %s1827_s13, %s1628_s28 }
  0x12   : > { %v474_v19 = vpack.c.bf16 %v472_v18, %v472_v18  ;;  %v1469_v23 = vld [vmem:[%s1819_s5 + $0x20] sm:$0xff]  ;;  %v1467_v25 = vld [vmem:[%s1819_s5 + $0x10] sm:$0xff]  ;;  %v1472_v26 = vld [vmem:[%s1819_s5 + $0x38] sm:$0xff] }
  0x13   : > { %1335 = vmatmul.msk.bf16.vlgmr.msra.gmra.mxu0 %vm519_vm0, %v473_v15  ;;  %1344 = vmatmul.msk.bf16.vlgmr.msra.gmra.mxu1 %vm519_vm0, %v473_v15  ;;  %v1465_v24 = vld [vmem:[%s1819_s5] sm:$0xff]  ;;  %v1471_v27 = vld [vmem:[%s1819_s5 + $0x30] sm:$0xff] }
  0x14   : > { %664 = vmatpush.bf16.msrb.mxu0 %v1458_v8  ;;  %689 = vmatpush.bf16.msrb.mxu1 %v1460_v9  ;;  %v1486_v34 = vld [vmem:[%s1821_s7] ss:$0 sm:$0xff]  ;;  %v1487_v35 = vld [vmem:[%s1821_s7 + $0x1] ss:$0 sm:$0xff]  ;;  %v1488_v46 = vld [vmem:[%s1821_s7 + $0x2] ss:$0 sm:$0xff] }
  0x15   : > { %1353 = vmatmul.msk.bf16.vlgmr.msra.gmra.mxu2 %vm519_vm0, %v473_v15  ;;  %1362 = vmatmul.msk.bf16.vlgmr.msra.gmra.mxu3 %vm519_vm0, %v473_v15  ;;  %v1483_v42 = vld [vmem:[%s1820_s6 + $0x1] ss:$0 sm:$0xff]  ;;  %v1482_v45 = vld [vmem:[%s1820_s6] ss:$0 sm:$0xff]  ;;  %v1489_v47 = vld [vmem:[%s1821_s7 + $0x3] ss:$0 sm:$0xff] }
  0x16   : > { %714 = vmatpush.bf16.msrb.mxu2 %v1462_v10  ;;  %739 = vmatpush.bf16.msrb.mxu3 %v1464_v11  ;;  %v1484_v59 = vld [vmem:[%s1820_s6 + $0x2] ss:$0 sm:$0xff]  ;;  %v1485_v60 = vld [vmem:[%s1820_s6 + $0x3] ss:$0 sm:$0xff]  ;;  %v1490_v8 = vld [vmem:[%s1822_s8] ss:$0 sm:$0xff] }
  0x17   : > { %v1491_v9 = vld [vmem:[%s1822_s8 + $0x1] ss:$0 sm:$0xff]  ;;  %v1492_v15 = vld [vmem:[%s1822_s8 + $0x2] ss:$0 sm:$0xff] }
  0x18   : > { %665 = vmatpush.bf16.msrb.mxu0 %v1457_v13  ;;  %690 = vmatpush.bf16.msrb.mxu1 %v1459_v14 }
  0x1a   : > { %715 = vmatpush.bf16.msrb.mxu2 %v1461_v16  ;;  %740 = vmatpush.bf16.msrb.mxu3 %v1463_v17 }
  0x1c   : > { %796 = vmatpush.bf16.msra.mxu0 %v1466_v21  ;;  %821 = vmatpush.bf16.msra.mxu1 %v1468_v22 }
  0x1e   : > { %846 = vmatpush.bf16.msra.mxu2 %v1470_v20  ;;  %871 = vmatpush.bf16.msra.mxu3 %v1472_v26  ;;  %v1493_v26 = vld [vmem:[%s1822_s8 + $0x3] ss:$0 sm:$0xff] }
  0x20   : > { %797 = vmatpush.bf16.msra.mxu0 %v1465_v24  ;;  %822 = vmatpush.bf16.msra.mxu1 %v1467_v25 }
  0x22   : > { %847 = vmatpush.bf16.msra.mxu2 %v1469_v23  ;;  %872 = vmatpush.bf16.msra.mxu3 %v1471_v27 }
  0x23   : > { %1371 = vmatmul.msk.bf16.vlgmr.msrb.gmra.mxu0 %vm519_vm0, %v474_v19  ;;  %1380 = vmatmul.msk.bf16.vlgmr.msrb.gmra.mxu1 %vm519_vm0, %v474_v19 }
  0x25   : > { %1389 = vmatmul.msk.bf16.vlgmr.msrb.gmra.mxu2 %vm519_vm0, %v474_v19  ;;  %1398 = vmatmul.msk.bf16.vlgmr.msrb.gmra.mxu3 %vm519_vm0, %v474_v19 }
  0x33   : > { %1407 = vmatmul.msk.bf16.vlgmr.msra.gmra.mxu0 %vm519_vm0, %v474_v19  ;;  %1416 = vmatmul.msk.bf16.vlgmr.msra.gmra.mxu1 %vm519_vm0, %v474_v19 }
  0x35   : > { %1425 = vmatmul.msk.bf16.vlgmr.msra.gmra.mxu2 %vm519_vm0, %v474_v19  ;;  %1434 = vmatmul.msk.bf16.vlgmr.msra.gmra.mxu3 %vm519_vm0, %v474_v19 }
  0x90   : > { %v532_v28 = vpop.f32.mrf.mxu0  ;;  %v557_v29 = vpop.f32.mrf.mxu1 }
  0x91   : > { %v558_v50 = vadd.f32 %v1483_v42, %v557_v29  ;;  %v533_v53 = vadd.f32 %v1482_v45, %v532_v28 }
  0x93   : > { %v879_v58 = vpack.c.bf16 %v558_v50, %v558_v50  ;;  %v878_v63 = vpack.c.bf16 %v533_v53, %v533_v53 }
  0x98   : > { %v582_v30 = vpop.f32.mrf.mxu2  ;;  %v607_v31 = vpop.f32.mrf.mxu3 }
  0x99   : > { %v534_v32 = vpop.f32.mrf.mxu0  ;;  %v559_v33 = vpop.f32.mrf.mxu1  ;;  %v583_v2 = vadd.f32 %v1484_v59, %v582_v30  ;;  %v608_v3 = vadd.f32 %v1485_v60, %v607_v31 }
  0x9a   : > { %v967_v33 = vld [vmem:[%s465_s16] sm:$0xff] }
  0x9b   : > { %v880_v6 = vpack.c.bf16 %v583_v2, %v583_v2  ;;  %v881_v7 = vpack.c.bf16 %v608_v3, %v608_v3  ;;  %vm968_vm3 = vcmp.eq.s32.totalorder %v967_v33, 0  ;;  %v1111_v33 = vld [vmem:[%s1823_s9 + $0xc] sm:$0xf] }
  0xa0   : > { %v584_v36 = vpop.f32.mrf.mxu2  ;;  %v609_v37 = vpop.f32.mrf.mxu3 }
  0xa1   : > { %v667_v38 = vpop.f32.mrf.mxu0  ;;  %v692_v39 = vpop.f32.mrf.mxu1 }
  0xa2   : > { %v668_v40 = vadd.f32 %v1486_v34, %v667_v38  ;;  %v693_v41 = vadd.f32 %v1487_v35, %v692_v39 }
  0xa4   : > { %v882_v43 = vpack.c.bf16 %v668_v40, %v668_v40  ;;  %v883_v44 = vpack.c.bf16 %v693_v41, %v693_v41 }
  0xa6   : > { %v891_v48 = vsel %vm886_vm1, %v882_v43, 0  ;;  %v910_v49 = vsel %vm886_vm1, %v883_v44, 0 }
  0xa7   : > { %900 = vmatpush.bf16.xpose.msrb.mxu0 %v891_v48  ;;  %919 = vmatpush.bf16.xpose.msrb.mxu1 %v910_v49 }
  0xa8   : > { %v717_v51 = vpop.f32.mrf.mxu2  ;;  %v742_v52 = vpop.f32.mrf.mxu3 }
  0xa9   : > { %v718_v54 = vadd.f32 %v1488_v46, %v717_v51  ;;  %v743_v55 = vadd.f32 %v1489_v47, %v742_v52  ;;  %v669_v56 = vpop.f32.mrf.mxu0  ;;  %v694_v57 = vpop.f32.mrf.mxu1 }
  0xab   : > { %v884_v61 = vpack.c.bf16 %v718_v54, %v718_v54  ;;  %v885_v62 = vpack.c.bf16 %v743_v55, %v743_v55 }
  0xad   : > { %v929_v0 = vsel %vm886_vm1, %v884_v61, 0  ;;  %v948_v1 = vsel %vm886_vm1, %v885_v62, 0 }
  0xae   : > { %938 = vmatpush.bf16.xpose.msrb.mxu2 %v929_v0  ;;  %957 = vmatpush.bf16.xpose.msrb.mxu3 %v948_v1 }
  0xaf   : > { %1435 = vmatmul.msk.bf16.vlgmr.msrb.gmra.mxu0 %vm886_vm1, %v878_v63  ;;  %1436 = vmatmul.msk.bf16.vlgmr.msrb.gmra.mxu1 %vm886_vm1, %v879_v58 }
  0xb0   : > { %v719_v4 = vpop.f32.mrf.mxu2  ;;  %v744_v5 = vpop.f32.mrf.mxu3 }
  0xb1   : > { %v799_v10 = vpop.f32.mrf.mxu0  ;;  %v824_v11 = vpop.f32.mrf.mxu1 }
  0xb2   : > { %v800_v13 = vadd.f32 %v1490_v8, %v799_v10  ;;  %v825_v14 = vadd.f32 %v1491_v9, %v824_v11 }
  0xb4   : > { %v1023_v16 = vpack.c.bf16 %v800_v13, %v800_v13  ;;  %v1024_v17 = vpack.c.bf16 %v825_v14, %v825_v14 }
  0xb5   : > { %1437 = vmatmul.msk.bf16.vlgmr.msrb.gmra.mxu2 %vm886_vm1, %v880_v6  ;;  %1438 = vmatmul.msk.bf16.vlgmr.msrb.gmra.mxu3 %vm886_vm1, %v881_v7 }
  0xb6   : > { %v1032_v19 = vsel %vm1030_vm2, %v1023_v16, 0  ;;  %v1051_v20 = vsel %vm1030_vm2, %v1024_v17, 0 }
  0xb7   : > { %1041 = vmatpush.bf16.msra.mxu0 %v1032_v19  ;;  %1060 = vmatpush.bf16.msra.mxu1 %v1051_v20 }
  0xb8   : > { %v849_v18 = vpop.f32.mrf.mxu2  ;;  %v874_v27 = vpop.f32.mrf.mxu3 }
  0xb9   : > { %v850_v21 = vadd.f32 %v1492_v15, %v849_v18  ;;  %v801_v23 = vpop.f32.mrf.mxu0  ;;  %v826_v24 = vpop.f32.mrf.mxu1  ;;  %v875_v29 = vadd.f32 %v1493_v26, %v874_v27  ;;  %v1108_v27 = vld [vmem:[%s1823_s9] sm:$0xf] }
  0xbb   : > { %v1025_v22 = vpack.c.bf16 %v850_v21, %v850_v21  ;;  %v1026_v30 = vpack.c.bf16 %v875_v29, %v875_v29  ;;  %v1109_v29 = vld [vmem:[%s1823_s9 + $0x4] sm:$0xf] }
  0xbd   : > { %v1070_v25 = vsel %vm1030_vm2, %v1025_v22, 0  ;;  %v1089_v31 = vsel %vm1030_vm2, %v1026_v30, 0  ;;  %v1135_v30 = vsel %vm1030_vm2, %v1109_v29, 0 }
  0xbe   : > { %1079 = vmatpush.bf16.msra.mxu2 %v1070_v25  ;;  %1098 = vmatpush.bf16.msra.mxu3 %v1089_v31  ;;  %v1110_v31 = vld [vmem:[%s1823_s9 + $0x8] sm:$0xf] }
  0xbf   : > { %1144 = vmatpush.bf16.msrb.mxu1 %v1135_v30 }
  0xc0   : > { %v851_v28 = vpop.f32.mrf.mxu2  ;;  %v876_v32 = vpop.f32.mrf.mxu3 }
  0xc1   : > { %v1116_v28 = vsel %vm1030_vm2, %v1108_v27, 0  ;;  %v1154_v32 = vsel %vm1030_vm2, %v1110_v31, 0 }
  0xc2   : > { %1125 = vmatpush.bf16.msrb.mxu0 %v1116_v28  ;;  %1163 = vmatpush.bf16.msrb.mxu2 %v1154_v32 }
 0x12c   : > { %v902_v34 = vpop.f32.mrf.mxu0  ;;  %v921_v35 = vpop.f32.mrf.mxu1 }
 0x12d   : > { %v963_v36 = vmul.f32 0.35355338, %v902_v34  ;;  %v964_v39 = vmul.f32 0.35355338, %v921_v35  ;;  %v1173_v34 = vsel %vm1030_vm2, %v1111_v33, 0 }
 0x12e   : > { %1182 = vmatpush.bf16.msrb.mxu3 %v1173_v34 }
 0x12f   : > { %v971_v37 = vsel %vm968_vm3, -1e+09, %v963_v36  ;;  %v972_v42 = vsel %vm968_vm3, -1e+09, %v964_v39 }
 0x130   : > { %v975_v38 = vsel %vm886_vm1, %v971_v37, -inf  ;;  %v978_v45 = vsel %vm886_vm1, %v972_v42, -inf }
 0x131   : > { %976 = vmax.xlane.f32.xlu1 %v975_v38 }
 0x134   : > { %v904_v40 = vpop.f32.mrf.mxu0  ;;  %v923_v41 = vpop.f32.mrf.mxu1 }
 0x138   : > { %v940_v43 = vpop.f32.mrf.mxu2  ;;  %v959_v44 = vpop.f32.mrf.mxu3 }
 0x139   : > { %v965_v46 = vmul.f32 0.35355338, %v940_v43  ;;  %979 = vmax.xlane.f32.xlu1 %v978_v45  ;;  %v966_v49 = vmul.f32 0.35355338, %v959_v44 }
 0x13b   : > { %v973_v47 = vsel %vm968_vm3, -1e+09, %v965_v46  ;;  %v974_v52 = vsel %vm968_vm3, -1e+09, %v966_v49 }
 0x13c   : > { %v981_v48 = vsel %vm886_vm1, %v973_v47, -inf  ;;  %v984_v53 = vsel %vm886_vm1, %v974_v52, -inf }
 0x13d   : > { %982 = vmax.xlane.f32.xlu0 %v981_v48 }
 0x140   : > { %v942_v50 = vpop.f32.mrf.mxu2  ;;  %v961_v51 = vpop.f32.mrf.mxu3 }
 0x145   : > { %985 = vmax.xlane.f32.xlu0 %v984_v53 }
 0x1a4   : > { %v977_v54 = vpop.xlane.xlu1 %976 }
 0x1a5   : > { %v987_v55 = vsub.f32 %v971_v37, %v977_v54 }
 0x1a7   : > { %v991_v56 = vmul.f32 1.442695, %v987_v55 }
 0x1a9   : > { %1497 = vpow2.f32 %v991_v56 }
 0x1ac   : > { %v980_v57 = vpop.xlane.xlu1 %979 }
 0x1ad   : > { %v988_v58 = vsub.f32 %v972_v42, %v980_v57 }
 0x1af   : > { %v1498_v59 = vpop.eup %1497  ;;  %v993_v60 = vmul.f32 1.442695, %v988_v58 }
 0x1b0   : > { %v983_v61 = vpop.xlane.xlu0 %982  ;;  %v999_v62 = vsel %vm886_vm1, %v1498_v59, 0.0 }
 0x1b1   : > { %1499 = vpow2.f32 %v993_v60  ;;  %v989_v63 = vsub.f32 %v973_v47, %v983_v61  ;;  %1000 = vadd.xlane.f32.xlu0 %v999_v62 }
 0x1b3   : > { %v995_v0 = vmul.f32 1.442695, %v989_v63 }
 0x1b5   : > { %1501 = vpow2.f32 %v995_v0 }
 0x1b7   : > { %v1500_v1 = vpop.eup %1499 }
 0x1b8   : > { %v986_v2 = vpop.xlane.xlu0 %985  ;;  %v1002_v3 = vsel %vm886_vm1, %v1500_v1, 0.0 }
 0x1b9   : > { %v990_v4 = vsub.f32 %v974_v52, %v986_v2  ;;  %1003 = vadd.xlane.f32.xlu1 %v1002_v3  ;;  %v1525_v2 = vmov 32.0  }
 0x1bb   : > { %v1502_v5 = vpop.eup %1501  ;;  %v997_v6 = vmul.f32 1.442695, %v990_v4 }
 0x1bc   : > { %v1005_v7 = vsel %vm886_vm1, %v1502_v5, 0.0 }
 0x1bd   : > { %1503 = vpow2.f32 %v997_v6  ;;  %1006 = vadd.xlane.f32.xlu2 %v1005_v7 }
 0x1c3   : > { %v1504_v8 = vpop.eup %1503 }
 0x1c4   : > { %v1008_v9 = vsel %vm886_vm1, %v1504_v8, 0.0 }
 0x1c5   : > { %1009 = vadd.xlane.f32.xlu2 %v1008_v9 }
 0x224   : > { %v1001_v10 = vpop.xlane.xlu0 %1000 }
 0x225   : > { %1505 = vrcp.f32 %v1001_v10 }
 0x22b   : > { %v1506_v11 = vpop.eup %1505 }
 0x22c   : > { %v1015_v13 = vmul.f32 %v1506_v11, %v1498_v59  ;;  %v1004_v14 = vpop.xlane.xlu1 %1003  ;;  %v1494_v59 = vld [vmem:[%s1824_s10] ss:$0 sm:$0xff] }
 0x22d   : > { %1507 = vrcp.f32 %v1004_v14 }
 0x22e   : > { %v1019_v15 = vpack.c.bf16 %v1015_v13, %v1015_v13 }
 0x230   : > { %v1007_v16 = vpop.xlane.xlu2 %1006  ;;  %1439 = vmatmul.msk.bf16.vlgmr.msra.gmra.mxu0 %vm886_vm1, %v1019_v15 }
 0x231   : > { %1509 = vrcp.f32 %v1007_v16 }
 0x233   : > { %v1508_v17 = vpop.eup %1507 }
 0x234   : > { %v1016_v18 = vmul.f32 %v1508_v17, %v1500_v1 }
 0x236   : > { %v1020_v19 = vpack.c.bf16 %v1016_v18, %v1016_v18 }
 0x237   : > { %v1510_v20 = vpop.eup %1509 }
 0x238   : > { %v1017_v21 = vmul.f32 %v1510_v20, %v1502_v5  ;;  %v1010_v22 = vpop.xlane.xlu2 %1009  ;;  %1440 = vmatmul.msk.bf16.vlgmr.msra.gmra.mxu1 %vm886_vm1, %v1020_v19 }
 0x239   : > { %1511 = vrcp.f32 %v1010_v22 }
 0x23a   : > { %v1021_v23 = vpack.c.bf16 %v1017_v21, %v1017_v21  ;;  %1513 = vrcp.f32 %v1525_v2 }
 0x23c   : > { %1441 = vmatmul.msk.bf16.vlgmr.msra.gmra.mxu2 %vm886_vm1, %v1021_v23  ;;  %v1495_v23 = vld [vmem:[%s1825_s11] ss:$0 sm:$0xff] }
 0x23f   : > { %v1512_v24 = vpop.eup %1511 }
 0x240   : > { %v1018_v25 = vmul.f32 %v1512_v24, %v1504_v8  ;;  %v1514_v3 = vpop.eup %1513 }
 0x241   : > { %v1205_v4 = vmul.f32 32.0, %v1514_v3  ;;  %vm1209_vm4 = vweird.f32 %v1514_v3 }
 0x242   : > { %v1022_v26 = vpack.c.bf16 %v1018_v25, %v1018_v25  ;;  %v1496_v25 = vld [vmem:[%s1826_s12] ss:$0 sm:$0xff] }
 0x243   : > { %v1206_v5 = vsub.f32 1.0, %v1205_v4 }
 0x244   : > { %1442 = vmatmul.msk.bf16.vlgmr.msra.gmra.mxu3 %vm886_vm1, %v1022_v26 }
 0x245   : > { %v1207_v6 = vmul.f32 %v1514_v3, %v1206_v5 }
 0x247   : > { %v1208_v7 = vadd.f32 %v1514_v3, %v1207_v6 }
 0x249   : > { %v1210_v8 = vsel %vm1209_vm4, %v1514_v3, %v1208_v7 }
 0x2ad   : > { %v1043_v35 = vpop.f32.mrf.mxu0 }
 0x2ae   : > { %v1104_v36 = vpack.c.bf16 %v1043_v35, %v1043_v35 }
 0x2b0   : > { %1443 = vmatmul.msk.bf16.vlgmr.msrb.gmra.mxu0 %vm886_vm1, %v1104_v36 }
 0x2b5   : > { %v1045_v37 = vpop.f32.mrf.mxu0  ;;  %v1062_v38 = vpop.f32.mrf.mxu1 }
 0x2b6   : > { %v1105_v39 = vpack.c.bf16 %v1062_v38, %v1062_v38 }
 0x2b8   : > { %1444 = vmatmul.msk.bf16.vlgmr.msrb.gmra.mxu1 %vm886_vm1, %v1105_v39 }
 0x2bd   : > { %v1064_v40 = vpop.f32.mrf.mxu1 }
 0x2bf   : > { %v1081_v41 = vpop.f32.mrf.mxu2 }
 0x2c0   : > { %v1106_v42 = vpack.c.bf16 %v1081_v41, %v1081_v41 }
 0x2c2   : > { %1445 = vmatmul.msk.bf16.vlgmr.msrb.gmra.mxu2 %vm886_vm1, %v1106_v42 }
 0x2c7   : > { %v1083_v43 = vpop.f32.mrf.mxu2  ;;  %v1100_v44 = vpop.f32.mrf.mxu3 }
 0x2c8   : > { %v1107_v45 = vpack.c.bf16 %v1100_v44, %v1100_v44 }
 0x2ca   : > { %1446 = vmatmul.msk.bf16.vlgmr.msrb.gmra.mxu3 %vm886_vm1, %v1107_v45 }
 0x2cf   : > { %v1102_v46 = vpop.f32.mrf.mxu3 }
 0x32d   : > { %v1127_v47 = vpop.f32.mrf.mxu0 }
 0x32e   : > { %v1188_v53 = vsel %vm519_vm0, %v1127_v47, 0.0 }
 0x335   : > { %v1129_v48 = vpop.f32.mrf.mxu0  ;;  %v1146_v49 = vpop.f32.mrf.mxu1 }
 0x336   : > { %v1189_v52 = vsel %vm519_vm0, %v1146_v49, 0.0 }
 0x337   : > { %v1190_v55 = vadd.f32 %v1189_v52, %v1188_v53 }
 0x33d   : > { %v1148_v50 = vpop.f32.mrf.mxu1 }
 0x345   : > { %v1165_v51 = vpop.f32.mrf.mxu2 }
 0x346   : > { %v1191_v54 = vsel %vm519_vm0, %v1165_v51, 0.0 }
 0x347   : > { %v1192_v56 = vadd.f32 %v1191_v54, %v1190_v55 }
 0x34d   : > { %v1167_v57 = vpop.f32.mrf.mxu2  ;;  %v1184_v58 = vpop.f32.mrf.mxu3 }
 0x34e   : > { %v1193_v60 = vsel %vm519_vm0, %v1184_v58, 0.0 }
 0x34f   : > { %v1194_v61 = vadd.f32 %v1193_v60, %v1192_v56 }
 0x351   : > { %v1199_v62 = vadd.f32 %v1494_v59, %v1194_v61 }
 0x353   : > { %v1200_v63 = vadd.f32 %v1199_v62, %v1646_v12 }
 0x355   : > { %v1186_v0 = vpop.f32.mrf.mxu3  ;;  %v1201_v1 = vsel %vm519_vm0, %v1200_v63, 0.0 }
 0x356   : > { %1202 = vadd.xlane.f32.xlu2 %v1201_v1 }
 0x3c9   : > { %v1203_v9 = vpop.xlane.xlu2 %1202 }
 0x3ca   : > { %v1211_v10 = vmul.f32 %v1210_v8, %v1203_v9 }
 0x3cc   : > { %v1212_v11 = vsub.f32 %v1200_v63, %v1211_v10 }
 0x3ce   : > { %v1213_v13 = vmul.f32 %v1212_v11, %v1212_v11 }
 0x3d0   : > { %v1214_v14 = vsel %vm519_vm0, %v1213_v13, 0.0 }
 0x3d1   : > { %1215 = vadd.xlane.f32.xlu0 %v1214_v14 }
 0x444   : > { %v1216_v12 = vpop.xlane.xlu0 %1215 }
 0x445   : > { %v1217_v15 = vmul.f32 %v1216_v12, %v1210_v8 }
 0x447   : > { %v1218_v16 = vadd.f32 1e-05, %v1217_v15 }
 0x449   : > { %1515 = vrsqrt.f32 %v1218_v16  ;;  %vm1225_vm6 = vweird.f32 %v1218_v16 }
 0x44f   : > { %v1516_v17 = vpop.eup %1515 }
 0x450   : > { %v1220_v18 = vmul.f32 %v1516_v17, %v1218_v16  ;;  %vm1226_vm5 = vweird.f32 %v1516_v17 }
 0x451   : > { %vm1227_vm7 = vmor %vm1225_vm6, %vm1226_vm5 }
 0x452   : > { %v1221_v19 = vmul.f32 %v1516_v17, %v1220_v18 }
 0x454   : > { %v1222_v20 = vmul.f32 0.5, %v1221_v19 }
 0x456   : > { %v1223_v21 = vsub.f32 1.5, %v1222_v20 }
 0x458   : > { %v1224_v22 = vmul.f32 %v1516_v17, %v1223_v21 }
 0x45a   : > { %v1228_v24 = vsel %vm1227_vm7, %v1516_v17, %v1224_v22 }
 0x45b   : > { %v1229_v26 = vmul.f32 %v1228_v24, %v1212_v11 }
 0x45d   : > { %v1234_v27 = vmul.f32 %v1495_v23, %v1229_v26 }
 0x45f   : > { %v1239_v28 = vadd.f32 %v1496_v25, %v1234_v27 }
 0x461   : > { %1240 = vst.msk [vmem:[%s469_s18] sm:$0xff] %vm519_vm0, %v1239_v28 }
 0x462 PF: > { %s23_s25 = sadd.s32 1, %s1523_s25  }
 0x463   : > { %p20_p4 = scmp.ge.s32.totalorder %s23_s25, 4  }
 0x465   :  { %22 = sbr.rel (!%p20_p4) target bundleno = 1 (0x1), region = 108 }

</bundles_post_ra>
